<compile_context>
chip_gen: v7x
topology: tpu7x:2x2x1
jax: 0.10.0
libtpu: 0.0.40
codegen_flags: <defaults>
</compile_context>

<pallas_src>
import jax
import jax.numpy as jnp
from jax.experimental import pallas as pl
from jax.experimental.pallas import tpu as pltpu

# ---- config (small, consistent with the module) -----------------------------
B = 2          # batch
N = 8          # number of image regions per sample
H = 32         # hidden_size
DF = 2048      # image feature dim (fixed by the module)
DL = 5         # location feature dim (fixed by the module)
LN_EPS = 1e-12

# pvec row layout: rows 0..4 = W_loc.T (5, H); row 5 = fused bias; row 6 = gamma;
# row 7 = beta.  (8, H) -> one sublane-aligned parameter block.
_ROW_BIAS = DL
_ROW_GAMMA = DL + 1
_ROW_BETA = DL + 2


def bert_image_embeddings_kernel(xf_ref, xp_ref, w_img_ref, pvec_ref, out_ref):
    # Image projection on the MXU: (M, 2048) contracted with (H, 2048) on dim 1
    # (lane-dense torch layout, no transpose anywhere).  HIGHEST precision keeps
    # the K=2048 f32 contraction at full f32 accuracy.
    y = jax.lax.dot_general(
        xf_ref[...], w_img_ref[...],
        dimension_numbers=(((1,), (1,)), ((), ())),
        preferred_element_type=jnp.float32,
        precision=jax.lax.Precision.HIGHEST,
    )

    # Location projection (effective K=5) on the VPU: five broadcast FMAs,
    # no second MXU weight push and no padded operands.
    xp = xp_ref[...]                                    # (M, 5)
    for k in range(DL):
        y = y + xp[:, k:k + 1] * pvec_ref[k:k + 1, :]   # (M,1)*(1,H)

    # Fused bias = b_img + b_loc + image_type_embeddings.weight[0].
    y = y + pvec_ref[_ROW_BIAS:_ROW_BIAS + 1, :]

    # LayerNorm (f32); rsqrt goes to the EUP slot.
    mu = jnp.mean(y, axis=-1, keepdims=True)
    c = y - mu
    var = jnp.mean(c * c, axis=-1, keepdims=True)
    normed = c * jax.lax.rsqrt(var + LN_EPS)
    out_ref[...] = (normed * pvec_ref[_ROW_GAMMA:_ROW_GAMMA + 1, :]
                    + pvec_ref[_ROW_BETA:_ROW_BETA + 1, :])
    # TODO(synk): dropout omitted (eval-mode identity); img_masks/mask_embedding
    # substitution and the adv_training delta-add branch omitted (training-only).


def prepare_params(params):
    """One-time parameter packing. Call at init, NOT per forward call."""
    bias_total = params["b_img"] + params["b_loc"] + params["type_table"][0]
    pvec = jnp.concatenate(
        [params["w_loc"].T,                # (5, H)
         bias_total[None, :],              # (1, H)
         params["gamma"][None, :],         # (1, H)
         params["beta"][None, :]],         # (1, H)
        axis=0)                            # -> (8, H)
    # W_img stays in native torch (H, 2048) layout: lane-dense rows, no padding.
    return {"w_img": params["w_img"], "pvec": pvec}


@jax.jit
def bert_image_embeddings(img_feat, img_pos_feat, w_img, pvec):
    """img_feat: (B, N, 2048) f32; img_pos_feat: (B, N, 5) f32;
    w_img: (H, 2048) f32 (torch layout); pvec: (8, H) f32 packed params."""
    Bs, Ns, _ = img_feat.shape
    M = Bs * Ns

    xf = img_feat.reshape(M, DF)        # contiguous view, no data movement
    xp = img_pos_feat.reshape(M, DL)

    vmem = pltpu.MemorySpace.VMEM
    out = pl.pallas_call(
        bert_image_embeddings_kernel,
        out_shape=jax.ShapeDtypeStruct((M, H), jnp.float32),
        # Grid-less, single-invocation call: whole arrays live in VMEM,
        # single-buffered (no pipeline machinery for a 1-step problem).
        in_specs=[
            pl.BlockSpec(memory_space=vmem),   # xf   (M, 2048)
            pl.BlockSpec(memory_space=vmem),   # xp   (M, 5)
            pl.BlockSpec(memory_space=vmem),   # W_img (H, 2048), lane-dense
            pl.BlockSpec(memory_space=vmem),   # pvec (8, H)
        ],
        out_specs=pl.BlockSpec(memory_space=vmem),
    )(xf, xp, w_img, pvec)

    return out.reshape(Bs, Ns, H)


def reference(img_feat, img_pos_feat, p):
    """Pure-JAX mirror of the PyTorch forward (eval mode)."""
    hp = jax.lax.Precision.HIGHEST
    img_emb = jnp.dot(img_feat, p["w_img"].T, precision=hp) + p["b_img"]
    loc_emb = jnp.dot(img_pos_feat, p["w_loc"].T, precision=hp) + p["b_loc"]
    y = img_emb + loc_emb + p["type_table"][0]
    mu = y.mean(-1, keepdims=True)
    var = ((y - mu) ** 2).mean(-1, keepdims=True)
    return (y - mu) / jnp.sqrt(var + LN_EPS) * p["gamma"] + p["beta"]


if __name__ == "__main__":
    key = jax.random.PRNGKey(0)
    ks = jax.random.split(key, 9)

    params = {
        "w_img": 0.02 * jax.random.normal(ks[0], (H, DF), jnp.float32),  # torch (out, in)
        "b_img": 0.02 * jax.random.normal(ks[1], (H,), jnp.float32),
        "w_loc": 0.02 * jax.random.normal(ks[2], (H, DL), jnp.float32),  # torch (out, in)
        "b_loc": 0.02 * jax.random.normal(ks[3], (H,), jnp.float32),
        "type_table": 0.02 * jax.random.normal(ks[4], (1, H), jnp.float32),  # nn.Embedding(1, H)
        "gamma": 1.0 + 0.02 * jax.random.normal(ks[5], (H,), jnp.float32),
        "beta": 0.02 * jax.random.normal(ks[6], (H,), jnp.float32),
    }

    img_feat = jax.random.normal(ks[7], (B, N, DF), jnp.float32)
    img_pos_feat = jax.random.uniform(ks[8], (B, N, DL), jnp.float32)

    # One-time parameter packing (hoisted out of the call path).
    packed = prepare_params(params)
    packed = jax.tree_util.tree_map(jax.block_until_ready, packed)

    out = bert_image_embeddings(img_feat, img_pos_feat,
                                packed["w_img"], packed["pvec"])
    jax.block_until_ready(out)

    ref = reference(img_feat, img_pos_feat, params)
    assert out.shape == (B, N, H)
    # HIGHEST-precision in-kernel contraction -> typical agreement ~1e-6.
    assert jnp.allclose(out, ref, atol=1e-4, rtol=1e-4), "mismatch vs pure-JAX reference"

    print("KERNEL_OK")
</pallas_src>

<mosaic_0001>
module attributes {stable_mosaic.version = 11 : i64} {
  func.func @bert_image_embeddings_kernel(%arg0: memref<16x2048xf32, #tpu.memory_space<vmem>>, %arg1: memref<16x5xf32, #tpu.memory_space<vmem>>, %arg2: memref<32x2048xf32, #tpu.memory_space<vmem>>, %arg3: memref<8x32xf32, #tpu.memory_space<vmem>>, %arg4: memref<16x32xf32, #tpu.memory_space<vmem>>) attributes {dimension_semantics = [], scalar_prefetch = 0 : i64, scratch_operands = 0 : i64, tpu.core_type = #tpu.core_type<tc>} {
    %c0 = arith.constant 0 : index
    %c0_0 = arith.constant 0 : index
    %0 = vector.load %arg0[%c0, %c0_0] : memref<16x2048xf32, #tpu.memory_space<vmem>>, vector<16x2048xf32>
    %c0_1 = arith.constant 0 : index
    %c0_2 = arith.constant 0 : index
    %1 = vector.load %arg2[%c0_1, %c0_2] : memref<32x2048xf32, #tpu.memory_space<vmem>>, vector<32x2048xf32>
    %cst = arith.constant dense<0.000000e+00> : vector<16x32xf32>
    %2 = tpu.matmul %0, %1, %cst {dimension_numbers = #tpu.dot_dimension_numbers<[1], [1], [0], [0], [0, 0, 1, 0], [], []>, precision = #tpu.contract_precision<fp32>} : vector<16x2048xf32>, vector<32x2048xf32>, vector<16x32xf32> -> vector<16x32xf32>
    %c0_3 = arith.constant 0 : index
    %c0_4 = arith.constant 0 : index
    %3 = vector.load %arg1[%c0_3, %c0_4] : memref<16x5xf32, #tpu.memory_space<vmem>>, vector<16x5xf32>
    %4 = vector.extract_strided_slice %3 {offsets = [0, 0], sizes = [16, 1], strides = [1, 1]} : vector<16x5xf32> to vector<16x1xf32>
    %c0_5 = arith.constant 0 : index
    %c0_6 = arith.constant 0 : index
    %5 = vector.load %arg3[%c0_5, %c0_6] : memref<8x32xf32, #tpu.memory_space<vmem>>, vector<1x32xf32>
    %6 = vector.broadcast %4 : vector<16x1xf32> to vector<16x32xf32>
    %7 = vector.broadcast %5 : vector<1x32xf32> to vector<16x32xf32>
    %8 = arith.mulf %6, %7 : vector<16x32xf32>
    %9 = arith.addf %2, %8 : vector<16x32xf32>
    %10 = vector.extract_strided_slice %3 {offsets = [0, 1], sizes = [16, 1], strides = [1, 1]} : vector<16x5xf32> to vector<16x1xf32>
    %c1 = arith.constant 1 : index
    %c0_7 = arith.constant 0 : index
    %11 = vector.load %arg3[%c1, %c0_7] : memref<8x32xf32, #tpu.memory_space<vmem>>, vector<1x32xf32>
    %12 = vector.broadcast %10 : vector<16x1xf32> to vector<16x32xf32>
    %13 = vector.broadcast %11 : vector<1x32xf32> to vector<16x32xf32>
    %14 = arith.mulf %12, %13 : vector<16x32xf32>
    %15 = arith.addf %9, %14 : vector<16x32xf32>
    %16 = vector.extract_strided_slice %3 {offsets = [0, 2], sizes = [16, 1], strides = [1, 1]} : vector<16x5xf32> to vector<16x1xf32>
    %c2 = arith.constant 2 : index
    %c0_8 = arith.constant 0 : index
    %17 = vector.load %arg3[%c2, %c0_8] : memref<8x32xf32, #tpu.memory_space<vmem>>, vector<1x32xf32>
    %18 = vector.broadcast %16 : vector<16x1xf32> to vector<16x32xf32>
    %19 = vector.broadcast %17 : vector<1x32xf32> to vector<16x32xf32>
    %20 = arith.mulf %18, %19 : vector<16x32xf32>
    %21 = arith.addf %15, %20 : vector<16x32xf32>
    %22 = vector.extract_strided_slice %3 {offsets = [0, 3], sizes = [16, 1], strides = [1, 1]} : vector<16x5xf32> to vector<16x1xf32>
    %c3 = arith.constant 3 : index
    %c0_9 = arith.constant 0 : index
    %23 = vector.load %arg3[%c3, %c0_9] : memref<8x32xf32, #tpu.memory_space<vmem>>, vector<1x32xf32>
    %24 = vector.broadcast %22 : vector<16x1xf32> to vector<16x32xf32>
    %25 = vector.broadcast %23 : vector<1x32xf32> to vector<16x32xf32>
    %26 = arith.mulf %24, %25 : vector<16x32xf32>
    %27 = arith.addf %21, %26 : vector<16x32xf32>
    %28 = vector.extract_strided_slice %3 {offsets = [0, 4], sizes = [16, 1], strides = [1, 1]} : vector<16x5xf32> to vector<16x1xf32>
    %c4 = arith.constant 4 : index
    %c0_10 = arith.constant 0 : index
    %29 = vector.load %arg3[%c4, %c0_10] : memref<8x32xf32, #tpu.memory_space<vmem>>, vector<1x32xf32>
    %30 = vector.broadcast %28 : vector<16x1xf32> to vector<16x32xf32>
    %31 = vector.broadcast %29 : vector<1x32xf32> to vector<16x32xf32>
    %32 = arith.mulf %30, %31 : vector<16x32xf32>
    %33 = arith.addf %27, %32 : vector<16x32xf32>
    %c5 = arith.constant 5 : index
    %c0_11 = arith.constant 0 : index
    %34 = vector.load %arg3[%c5, %c0_11] : memref<8x32xf32, #tpu.memory_space<vmem>>, vector<1x32xf32>
    %35 = vector.broadcast %34 : vector<1x32xf32> to vector<16x32xf32>
    %36 = arith.addf %33, %35 : vector<16x32xf32>
    %cst_12 = arith.constant dense<0.000000e+00> : vector<16xf32>
    %37 = vector.multi_reduction <add>, %36, %cst_12 [1] : vector<16x32xf32> to vector<16xf32>
    %38 = vector.shape_cast %37 : vector<16xf32> to vector<16x1xf32>
    %cst_13 = arith.constant 3.200000e+01 : f32
    %39 = vector.broadcast %cst_13 : f32 to vector<16x1xf32>
    %40 = arith.divf %38, %39 : vector<16x1xf32>
    %41 = vector.broadcast %40 : vector<16x1xf32> to vector<16x32xf32>
    %42 = arith.subf %36, %41 : vector<16x32xf32>
    %43 = arith.mulf %42, %42 : vector<16x32xf32>
    %cst_14 = arith.constant dense<0.000000e+00> : vector<16xf32>
    %44 = vector.multi_reduction <add>, %43, %cst_14 [1] : vector<16x32xf32> to vector<16xf32>
    %45 = vector.shape_cast %44 : vector<16xf32> to vector<16x1xf32>
    %cst_15 = arith.constant 3.200000e+01 : f32
    %46 = vector.broadcast %cst_15 : f32 to vector<16x1xf32>
    %47 = arith.divf %45, %46 : vector<16x1xf32>
    %cst_16 = arith.constant 9.99999996E-13 : f32
    %48 = vector.broadcast %cst_16 : f32 to vector<16x1xf32>
    %49 = arith.addf %47, %48 : vector<16x1xf32>
    %50 = math.rsqrt %49 : vector<16x1xf32>
    %51 = vector.broadcast %50 : vector<16x1xf32> to vector<16x32xf32>
    %52 = arith.mulf %42, %51 : vector<16x32xf32>
    %c6 = arith.constant 6 : index
    %c0_17 = arith.constant 0 : index
    %53 = vector.load %arg3[%c6, %c0_17] : memref<8x32xf32, #tpu.memory_space<vmem>>, vector<1x32xf32>
    %54 = vector.broadcast %53 : vector<1x32xf32> to vector<16x32xf32>
    %55 = arith.mulf %52, %54 : vector<16x32xf32>
    %c7 = arith.constant 7 : index
    %c0_18 = arith.constant 0 : index
    %56 = vector.load %arg3[%c7, %c0_18] : memref<8x32xf32, #tpu.memory_space<vmem>>, vector<1x32xf32>
    %57 = vector.broadcast %56 : vector<1x32xf32> to vector<16x32xf32>
    %58 = arith.addf %55, %57 : vector<16x32xf32>
    %c0_19 = arith.constant 0 : index
    %c0_20 = arith.constant 0 : index
    %59 = vector.load %arg4[%c0_19, %c0_20] : memref<16x32xf32, #tpu.memory_space<vmem>>, vector<16x32xf32>
    tpu.vector_store %arg4[%c0_19, %c0_20], %58 {strides = array<i32>} : memref<16x32xf32, #tpu.memory_space<vmem>>, vector<16x32xf32>,
    return
  }
}

</mosaic_0001>

<bundles_post_ra>
// kernel: bert_image_embeddings.1
= control target key start
LH: loop header
LB: loop body
LE: loop exit
PB: predicated region body
PF: predicated region fallthrough
CT: control target
= control target key end

     0   :  { %9 = vsyncpa [#allocation3], 0  ;;  %s7049_s0 = inlined_call_operand.hbm [shape: f32[16,2048], index: 0, kind: input, shape index: {}]   ;;  %s7050_s1 = inlined_call_operand.vmem [shape: f32[16,5], index: 1, kind: input, shape index: {}]   ;;  %s7051_s2 = inlined_call_operand.hbm [shape: f32[32,2048], index: 2, kind: input, shape index: {}]   ;;  %s7052_s3 = inlined_call_operand.vmem [shape: f32[8,32], index: 3, kind: input, shape index: {}]   ;;  %s7053_s4 = inlined_call_operand.hbm [shape: f32[16,32], index: 4, kind: output, shape index: {}]  }
   0x1   :  { %10 = vsyncpa [#allocation6], 0 }
   0x2   :  { %11 = vsyncpa [#allocation4], 0  ;;  %s5635_s15 = smov [#allocation2]   ;;  %s5563_s19 = scalar_lea.hbm %s7049_s0, 4096 }
   0x3   :  { %s17_s16 = sshll.u32 %s5635_s15, 4  ;;  %p5564_p0 = scmp.ne.s32.totalorder %s7049_s0, %s5563_s19  ;;  %s18_s16 = int_to_ptr.vmem [resolvable:$true] %s17_s16 }
   0x4   :  { %p5567_p1 = scmp.lt.u32.totalorder %s5563_s19, %s7049_s0 }
   0x6   :  { %p5569_p2 = pnand %p5567_p1, %p5564_p0 }
   0x8   :  { %5572 = shalt.err (!%p5569_p2)
}
   0x9   :  { %s5573_s24 = scalar_lea.vmem %s18_s16, 4096  ;;  %p5578_p4 = scmp.lt.s32.totalorder %s18_s16, %s18_s16 }
   0xa   :  { %p5574_p3 = scmp.ne.s32.totalorder %s18_s16, %s5573_s24  ;;  %p5579_p5 = scmp.lt.s32.totalorder %s5573_s24, %s5573_s24 }
   0xc   :  { %p5580_p6 = por %p5579_p5, %p5578_p4 }
   0xe   :  { %p5581_p7 = pnand %p5580_p6, %p5574_p3 }
  0x10   :  { %5584 = shalt.err (!%p5581_p7)
}
  0x11   :  { %s5636_s25 = smov 2048   ;;  %s5637_s26 = smov 128  }
  0x12   :  { %23 = dma.hbm_to_vmem [thread:$0]  %s7049_s0, 4096, %s18_s16, [#allocation3], %s5636_s25, %s5636_s25, %s5637_s26  }
  0x13   :  { %s5638_s29 = smov [#allocation5]   ;;  %s5585_s7 = scalar_lea.hbm %s7051_s2, 8192 }
  0x14   :  { %s31_s30 = sshll.u32 %s5638_s29, 4  ;;  %p5586_p8 = scmp.ne.s32.totalorder %s7051_s2, %s5585_s7  ;;  %s32_s30 = int_to_ptr.vmem [resolvable:$true] %s31_s30 }
  0x15   :  { %p5589_p9 = scmp.lt.u32.totalorder %s5585_s7, %s7051_s2 }
  0x17   :  { %p5591_p10 = pnand %p5589_p9, %p5586_p8 }
  0x19   :  { %5594 = shalt.err (!%p5591_p10)
}
  0x1a   :  { %s5595_s12 = scalar_lea.vmem %s32_s30, 8192  ;;  %p5600_p12 = scmp.lt.s32.totalorder %s32_s30, %s32_s30 }
  0x1b   :  { %p5596_p11 = scmp.ne.s32.totalorder %s32_s30, %s5595_s12  ;;  %p5601_p13 = scmp.lt.s32.totalorder %s5595_s12, %s5595_s12 }
  0x1d   :  { %p5602_p0 = por %p5601_p13, %p5600_p12 }
  0x1f   :  { %p5603_p1 = pnand %p5602_p0, %p5596_p11 }
  0x21   :  { %5606 = shalt.err (!%p5603_p1)
}
  0x22   :  { %37 = dma.hbm_to_vmem [thread:$0]  %s7051_s2, 8192, %s32_s30, [#allocation6], %s5636_s25, %s5636_s25, %s5637_s26  }
  0x23   :  { %5629 = dma.done.wait [#allocation3], 4096  }
  0x24   :  { %5630 = vsyncadd [#allocation3], 4294963200 }
  0x25   :  { %5631 = dma.done.wait [#allocation6], 8192  }
  0x26   :  { %5632 = vsyncadd [#allocation6], 4294959104  ;;  %v5639_v0 = vmov 0   ;;  %v79_v1 = vld [vmem:[#allocation5 + $0x8] sm:$0xff]  ;;  %v78_v3 = vld [vmem:[#allocation5] sm:$0xff]  ;;  %vm5084_vm0 = vcmask 261120  }
  0x27   :  { %5549 = vset.pattern.permute.xlu0 %v5639_v0  ;;  %v95_v2 = vld [vmem:[#allocation5 + $0x88] sm:$0xff]  ;;  %v161_v4 = vand.u32 4294901760, %v79_v1  ;;  %v94_v6 = vld [vmem:[#allocation5 + $0x80] sm:$0xff]  ;;  %v163_v7 = vand.u32 4294901760, %v78_v3  ;;  %s5644_s11 = smov [#allocation7]  }
  0x28   :  { %v165_v5 = vand.u32 4294901760, %v95_v2  ;;  %v111_v8 = vld [vmem:[#allocation5 + $0x108] sm:$0xff]  ;;  %v167_v10 = vand.u32 4294901760, %v94_v6  ;;  %v110_v13 = vld [vmem:[#allocation5 + $0x100] sm:$0xff]  ;;  %s5133_s12 = sshll.u32 %s5644_s11, 4  ;;  %s5134_s12 = int_to_ptr.vmem [resolvable:$true] %s5133_s12 }
  0x29   :  { %v127_v9 = vld [vmem:[#allocation5 + $0x188] sm:$0xff]  ;;  %v169_v11 = vand.u32 4294901760, %v111_v8  ;;  %v5699_v15 = vsub.f32 %v78_v3, %v163_v7  ;;  %v5701_v16 = vsub.f32 %v79_v1, %v161_v4  ;;  %v126_v18 = vld [vmem:[#allocation5 + $0x180] sm:$0xff]  ;;  %v171_v27 = vand.u32 4294901760, %v110_v13  ;;  %s5607_s0 = scalar_lea.vmem %s5134_s12, 256  ;;  %p5612_p3 = scmp.lt.s32.totalorder %s5134_s12, %s5134_s12 }
  0x2a   :  { %v173_v12 = vand.u32 4294901760, %v127_v9  ;;  %v5697_v14 = vpack.c.bf16 %v165_v5, %v161_v4  ;;  %v5703_v17 = vsub.f32 %v95_v2, %v165_v5  ;;  %v47_v19 = vld [vmem:[#allocation2 + $0x8] sm:$0xff]  ;;  %v5705_v20 = vpack.c.bf16 %v167_v10, %v163_v7  ;;  %v46_v40 = vld [vmem:[#allocation2] sm:$0xff]  ;;  %p5608_p2 = scmp.ne.s32.totalorder %s5134_s12, %s5607_s0  ;;  %p5613_p4 = scmp.lt.s32.totalorder %s5607_s0, %s5607_s0 }
  0x2b   :  { %v5707_v21 = vsub.f32 %v94_v6, %v167_v10  ;;  %v5711_v23 = vsub.f32 %v111_v8, %v169_v11  ;;  %v266_v25 = vand.u32 4294901760, %v5701_v16  ;;  %v175_v28 = vand.u32 4294901760, %v126_v18  ;;  %v142_v49 = vld [vmem:[%s7050_s1] sm:$0xff]  ;;  %v63_v58 = vld [vmem:[#allocation2 + $0x88] sm:$0xff] }
  0x2c   :  { %v5709_v22 = vpack.c.bf16 %v173_v12, %v169_v11  ;;  %5155 = vmatprep.subr.bf16.mxu0 %v5697_v14  ;;  %v5714_v24 = vsub.f32 %v127_v9, %v173_v12  ;;  %v278_v26 = vand.u32 4294901760, %v5703_v17  ;;  %v272_v29 = vand.u32 4294901760, %v5699_v15  ;;  %147 = vperm.xlu0 %5549, %v142_v49   ;;  %v62_v59 = vld [vmem:[#allocation2 + $0x80] sm:$0xff]  ;;  %v143_v60 = vld [vmem:[%s7050_s1 + $0x8] sm:$0xff]  ;;  %p5614_p5 = por %p5613_p4, %p5612_p3 }
  0x2d   :  { %5157 = vmatpush1.bf16.xpose.msra.mxu0 %v5705_v20  ;;  %v284_v30 = vand.u32 4294901760, %v5707_v21  ;;  %v5721_v31 = vand.u32 4294901760, %v47_v19  ;;  %v267_v32 = vsub.f32 %v5701_v16, %v266_v25  ;;  %v5730_v34 = vsub.f32 %v110_v13, %v171_v27 }
  0x2e   :  { %5159 = vmatprep.subr.bf16.mxu0 %v5709_v22  ;;  %v279_v33 = vsub.f32 %v5703_v17, %v278_v26  ;;  %v290_v35 = vand.u32 4294901760, %v5711_v23  ;;  %v5733_v36 = vpack.c.bf16 %v175_v28, %v171_v27  ;;  %v5735_v37 = vsub.f32 %v126_v18, %v175_v28  ;;  %p5615_p6 = pnand %p5614_p5, %p5608_p2 }
  0x2f   :  { %v273_v38 = vsub.f32 %v5699_v15, %v272_v29  ;;  %v285_v39 = vsub.f32 %v5707_v21, %v284_v30  ;;  %369 = vmatprep.mubr.f32.mxu1 %v5721_v31  ;;  %v268_v41 = vand.u32 4294901760, %v267_v32  ;;  %v5745_v43 = vsub.f32 %v47_v19, %v5721_v31 }
  0x30   :  { %v280_v42 = vand.u32 4294901760, %v279_v33  ;;  %v291_v44 = vsub.f32 %v5711_v23, %v290_v35  ;;  %v302_v47 = vand.u32 4294901760, %v5714_v24  ;;  %v5170_v48 = vpack.c.bf16 %v5703_v17, %v5701_v16  ;;  %152 = vperm.xlu0 %5549, %v143_v60   ;;  %v80_v17 = vld [vmem:[#allocation5 + $0x10] sm:$0xff] }
  0x31   :  { %v274_v45 = vand.u32 4294901760, %v273_v38  ;;  %v286_v46 = vand.u32 4294901760, %v285_v39  ;;  %v235_v51 = vand.u32 4294901760, %v5745_v43  ;;  %v5757_v53 = vand.u32 4294901760, %v46_v40  ;;  %v128_v60 = vld [vmem:[#allocation5 + $0x190] sm:$0xff] }
  0x32   :  { %v5162_v50 = vpack.c.bf16 %v280_v42, %v268_v41  ;;  %v292_v52 = vand.u32 4294901760, %v291_v44  ;;  %v303_v55 = vsub.f32 %v5714_v24, %v302_v47  ;;  %v296_v56 = vand.u32 4294901760, %v5730_v34  ;;  %v81_v42 = vld [vmem:[#allocation5 + $0x18] sm:$0xff] }
  0x33   :  { %v5164_v54 = vpack.c.bf16 %v286_v46, %v274_v45  ;;  %v308_v57 = vand.u32 4294901760, %v5735_v37  ;;  %v236_v61 = vsub.f32 %v5745_v43, %v235_v51  ;;  %v5771_v62 = vsub.f32 %v46_v40, %v5757_v53  ;;  %v97_v44 = vld [vmem:[#allocation5 + $0x98] sm:$0xff] }
  0x34   :  { %5163 = vmatprep.subr.bf16.mxu1 %v5162_v50  ;;  %v304_v63 = vand.u32 4294901760, %v303_v55  ;;  %v297_v0 = vsub.f32 %v5730_v34, %v296_v56  ;;  %v5781_v4 = vand.u32 4294901760, %v63_v58  ;;  %v5783_v5 = vand.u32 4294901760, %v62_v59 }
  0x35   :  { %5161 = vmatpush1.bf16.xpose.msra.mxu0 %v5733_v36  ;;  %5165 = vmatpush1.bf16.xpose.msra.mxu1 %v5164_v54  ;;  %v309_v1 = vsub.f32 %v5735_v37, %v308_v57  ;;  %v237_v2 = vand.u32 4294901760, %v236_v61  ;;  %v241_v3 = vand.u32 4294901760, %v5771_v62  ;;  %v5172_v13 = vpack.c.bf16 %v5707_v21, %v5699_v15  ;;  %v129_v15 = vld [vmem:[#allocation5 + $0x198] sm:$0xff] }
  0x36   :  { %5171 = vmatprep.subr.bf16.mxu0 %v5170_v48  ;;  %v5166_v6 = vpack.c.bf16 %v304_v63, %v292_v52  ;;  %v298_v7 = vand.u32 4294901760, %v297_v0  ;;  %v5789_v10 = vsub.f32 %v63_v58, %v5781_v4  ;;  %v5792_v11 = vsub.f32 %v62_v59, %v5783_v5  ;;  %v49_v48 = vld [vmem:[#allocation2 + $0x18] sm:$0xff]  ;;  %v112_v59 = vld [vmem:[#allocation5 + $0x110] sm:$0xff] }
  0x37   :  { %v310_v8 = vand.u32 4294901760, %v309_v1  ;;  %238 = vmatprep.mubr.f32.mxu0 %v237_v2  ;;  %v242_v9 = vsub.f32 %v5771_v62, %v241_v3  ;;  %v5174_v19 = vpack.c.bf16 %v5714_v24, %v5711_v23  ;;  %v5176_v40 = vpack.c.bf16 %v5735_v37, %v5730_v34  ;;  %v113_v52 = vld [vmem:[#allocation5 + $0x118] sm:$0xff]  ;;  %v48_v2 = vld [vmem:[#allocation2 + $0x10] sm:$0xff] }
  0x38   :  { %5167 = vmatprep.subr.bf16.mxu1 %v5166_v6  ;;  %v250_v27 = vand.u32 4294901760, %v5789_v10  ;;  %v256_v28 = vand.u32 4294901760, %v5792_v11  ;;  %v5186_v41 = vpack.c.bf16 %v278_v26, %v266_v25  ;;  %v767_v45 = vand.u32 4294901760, %v81_v42  ;;  %v96_v26 = vld [vmem:[#allocation5 + $0x90] sm:$0xff] }
  0x39   :  { %v5168_v12 = vpack.c.bf16 %v310_v8, %v298_v7  ;;  %v243_v18 = vand.u32 4294901760, %v242_v9  ;;  %v771_v46 = vand.u32 4294901760, %v97_v44  ;;  %v5188_v16 = vpack.c.bf16 %v284_v30, %v272_v29  ;;  %v65_v7 = vld [vmem:[#allocation2 + $0x98] sm:$0xff] }
  0x3a   :  { %v251_v32 = vsub.f32 %v5789_v10, %v250_v27  ;;  %v257_v33 = vsub.f32 %v5792_v11, %v256_v28  ;;  %v5190_v25 = vpack.c.bf16 %v302_v47, %v290_v35  ;;  %v5829_v49 = vsub.f32 %v81_v42, %v767_v45 }
  0x3b   :  { %v5831_v50 = vsub.f32 %v97_v44, %v771_v46  ;;  %v769_v21 = vand.u32 4294901760, %v80_v17  ;;  %v773_v29 = vand.u32 4294901760, %v96_v26  ;;  %v5835_v30 = vand.u32 4294901760, %v49_v48 }
  0x3c   :  { %244 = vmatmul.mubr.f32.vlgmr.msra.gmra.mrb[0].mxu0 %v243_v18  ;;  %v252_v38 = vand.u32 4294901760, %v251_v32  ;;  %v258_v39 = vand.u32 4294901760, %v257_v33  ;;  %v775_v23 = vand.u32 4294901760, %v113_v52  ;;  %v779_v24 = vand.u32 4294901760, %v129_v15  ;;  %v64_v18 = vld [vmem:[#allocation2 + $0x90] sm:$0xff] }
  0x3d   :  { %5169 = vmatpush1.bf16.xpose.msra.mxu1 %v5168_v12  ;;  %5173 = vmatpush1.bf16.xpose.msra.mxu0 %v5172_v13  ;;  %v872_v35 = vand.u32 4294901760, %v5829_v49  ;;  %v5842_v47 = vsub.f32 %v80_v17, %v769_v21  ;;  %v5849_v54 = vsub.f32 %v96_v26, %v773_v29  ;;  %v5852_v55 = vsub.f32 %v49_v48, %v5835_v30 }
  0x3e   :  { %5175 = vmatprep.subr.bf16.mxu0 %v5174_v19  ;;  %5179 = vmatprep.subr.bf16.mxu1 %v5697_v14  ;;  %v5856_v58 = vsub.f32 %v129_v15, %v779_v24  ;;  %v5858_v61 = vpack.c.bf16 %v771_v46, %v767_v45  ;;  %v781_v63 = vand.u32 4294901760, %v128_v60  ;;  %v5880_v8 = vpack.c.bf16 %v773_v29, %v769_v21 }
  0x3f   :  { %253 = vmatprep.mubr.f32.mxu0 %v252_v38  ;;  %v873_v34 = vsub.f32 %v5829_v49, %v872_v35  ;;  %v890_v0 = vand.u32 4294901760, %v5849_v54  ;;  %v841_v1 = vand.u32 4294901760, %v5852_v55  ;;  %v5898_v19 = vpack.c.bf16 %v779_v24, %v775_v23 }
  0x40   :  { %259 = vmatmul.mubr.f32.gmra.mrb[2].mxu0 %v258_v39  ;;  %v5890_v12 = vsub.f32 %v128_v60, %v781_v63  ;;  %v5912_v39 = vand.u32 4294901760, %v64_v18  ;;  %v5218_v29 = vpack.c.bf16 %v5831_v50, %v5829_v49 }
  0x41   :  { %465 = vmatprep.mubr.f32.mxu0 %v5745_v43  ;;  %v884_v43 = vand.u32 4294901760, %v5831_v50  ;;  %v874_v6 = vand.u32 4294901760, %v873_v34  ;;  %v891_v13 = vsub.f32 %v5849_v54, %v890_v0 }
  0x42   :  { %v914_v44 = vand.u32 4294901760, %v5890_v12  ;;  %v5926_v17 = vsub.f32 %v64_v18, %v5912_v39 }
  0x43   :  { %v885_v37 = vsub.f32 %v5831_v50, %v884_v43  ;;  %v82_v50 = vld [vmem:[#allocation5 + $0x20] sm:$0xff] }
  0x44   :  { %371 = vmatmul.mubr.f32.vlgmr.msra.gmra.mrb[0].mxu1 %v5757_v53  ;;  %v862_v24 = vand.u32 4294901760, %v5926_v17 }
  0x45   :  { %5177 = vmatpush1.bf16.xpose.msra.mxu0 %v5176_v40  ;;  %5181 = vmatpush1.bf16.xpose.msra.mxu1 %v5705_v20  ;;  %v892_v40 = vand.u32 4294901760, %v891_v13 }
  0x46   :  { %5183 = vmatprep.subr.bf16.mxu1 %v5709_v22  ;;  %5187 = vmatprep.subr.bf16.mxu0 %v5186_v41  ;;  %v863_v34 = vsub.f32 %v5926_v17, %v862_v24 }
  0x47   :  { %376 = vmatprep.mubr.f32.mxu1 %v5781_v4 }
  0x48   :  { %378 = vmatmul.mubr.f32.gmra.mrb[2].mxu1 %v5783_v5 }
  0x49   :  { %557 = vmatprep.mubr.f32.mxu1 %v235_v51  ;;  %v5192_v51 = vpack.c.bf16 %v308_v57, %v296_v56  ;;  %v878_v56 = vand.u32 4294901760, %v5842_v47  ;;  %v777_v57 = vand.u32 4294901760, %v112_v59 }
  0x4b   :  { %v879_v9 = vsub.f32 %v5842_v47, %v878_v56  ;;  %v5236_v49 = vpack.c.bf16 %v890_v0, %v878_v56 }
  0x4c   :  { %468 = vmatmul.mubr.f32.vlgmr.msra.gmra.mrb[4].mxu0 %v5771_v62 }
  0x4d   :  { %5185 = vmatpush1.bf16.xpose.msra.mxu1 %v5733_v36  ;;  %5189 = vmatpush1.bf16.xpose.msra.mxu0 %v5188_v16  ;;  %v880_v33 = vand.u32 4294901760, %v879_v9 }
  0x4e   :  { %474 = vmatprep.mubr.f32.mxu0 %v5789_v10  ;;  %5191 = vmatprep.subr.bf16.mxu0 %v5190_v25  ;;  %v5885_v10 = vand.u32 4294901760, %v48_v2  ;;  %v5928_v25 = vpack.c.bf16 %v781_v63, %v777_v57 }
  0x4f   :  { %5195 = vmatprep.subr.bf16.mxu1 %v5697_v14  ;;  %v5854_v14 = vsub.f32 %v113_v52, %v775_v23  ;;  %v5212_v26 = vpack.c.bf16 %v892_v40, %v880_v33  ;;  %v915_v52 = vsub.f32 %v5890_v12, %v914_v44 }
  0x50   :  { %477 = vmatmul.mubr.f32.gmra.mrb[6].mxu0 %v5792_v11  ;;  %v842_v11 = vsub.f32 %v5852_v55, %v841_v1  ;;  %v5910_v38 = vsub.f32 %v48_v2, %v5885_v10  ;;  %v864_v2 = vand.u32 4294901760, %v863_v34 }
  0x51   :  { %666 = vmatprep.mubr.f32.mxu0 %v5721_v31  ;;  %v896_v62 = vand.u32 4294901760, %v5854_v14  ;;  %v5222_v63 = vpack.c.bf16 %v5856_v58, %v5854_v14 }
  0x52   :  { %v843_v41 = vand.u32 4294901760, %v842_v11  ;;  %v51_v11 = vld [vmem:[#allocation2 + $0x28] sm:$0xff] }
  0x53   :  { %v5987_v56 = vand.u32 4294901760, %v51_v11 }
  0x54   :  { %561 = vmatmul.mubr.f32.vlgmr.msra.gmra.mrb[4].mxu1 %v241_v3  ;;  %v908_v3 = vand.u32 4294901760, %v5856_v58 }
  0x55   :  { %5193 = vmatpush1.bf16.xpose.msra.mxu0 %v5192_v51  ;;  %5197 = vmatpush1.bf16.xpose.msra.mxu1 %v5705_v20  ;;  %v886_v20 = vand.u32 4294901760, %v885_v37  ;;  %v6004_v33 = vsub.f32 %v51_v11, %v5987_v56 }
  0x56   :  { %568 = vmatprep.mubr.f32.mxu1 %v250_v27  ;;  %5199 = vmatprep.subr.bf16.mxu1 %v5709_v22  ;;  %v5888_v22 = vsub.f32 %v112_v59, %v777_v57  ;;  %v897_v27 = vsub.f32 %v5854_v14, %v896_v62  ;;  %v916_v59 = vand.u32 4294901760, %v915_v52  ;;  %v5220_v57 = vpack.c.bf16 %v5849_v54, %v5842_v47  ;;  %v131_v47 = vld [vmem:[#allocation5 + $0x1a8] sm:$0xff] }
  0x57   :  { %5203 = vmatprep.subr.bf16.mxu0 %v5858_v61  ;;  %v5210_v32 = vpack.c.bf16 %v886_v20, %v874_v6  ;;  %v5234_v6 = vpack.c.bf16 %v884_v43, %v872_v35  ;;  %v83_v20 = vld [vmem:[#allocation5 + $0x28] sm:$0xff]  ;;  %v5238_v35 = vpack.c.bf16 %v908_v3, %v896_v62  ;;  %v98_v43 = vld [vmem:[#allocation5 + $0xa0] sm:$0xff]  ;;  %v1375_v54 = vand.u32 4294901760, %v82_v50 }
  0x58   :  { %572 = vmatmul.mubr.f32.gmra.mrb[6].mxu1 %v256_v28  ;;  %v5906_v28 = vand.u32 4294901760, %v65_v7  ;;  %v902_v42 = vand.u32 4294901760, %v5888_v22  ;;  %v898_v45 = vand.u32 4294901760, %v897_v27  ;;  %v1373_v9 = vand.u32 4294901760, %v83_v20 }
  0x59   :  { %753 = vmatprep.mubr.f32.mxu1 %v5721_v31  ;;  %v909_v31 = vsub.f32 %v5856_v58, %v908_v3  ;;  %v1385_v58 = vand.u32 4294901760, %v131_v47  ;;  %v5994_v62 = vsub.f32 %v82_v50, %v1375_v54  ;;  %v1447_v52 = vand.u32 4294901760, %v6004_v33 }
  0x5a   :  { %v5921_v16 = vsub.f32 %v65_v7, %v5906_v28  ;;  %v903_v48 = vsub.f32 %v5888_v22, %v902_v42  ;;  %v99_v7 = vld [vmem:[#allocation5 + $0xa8] sm:$0xff]  ;;  %v5981_v18 = vsub.f32 %v83_v20, %v1373_v9  ;;  %v5240_v3 = vpack.c.bf16 %v914_v44, %v902_v42 }
  0x5b   :  { %v910_v46 = vand.u32 4294901760, %v909_v31  ;;  %v1377_v13 = vand.u32 4294901760, %v99_v7  ;;  %v115_v31 = vld [vmem:[#allocation5 + $0x128] sm:$0xff]  ;;  %v6008_v40 = vsub.f32 %v131_v47, %v1385_v58  ;;  %v1484_v42 = vand.u32 4294901760, %v5994_v62 }
  0x5c   :  { %668 = vmatmul.mubr.f32.vlgmr.msra.gmra.mrb[8].mxu0 %v5757_v53  ;;  %v856_v21 = vand.u32 4294901760, %v5921_v16  ;;  %v904_v51 = vand.u32 4294901760, %v903_v48  ;;  %v1381_v14 = vand.u32 4294901760, %v115_v31  ;;  %v1478_v0 = vand.u32 4294901760, %v5981_v18 }
  0x5d   :  { %5201 = vmatpush1.bf16.xpose.msra.mxu1 %v5733_v36  ;;  %5205 = vmatpush1.bf16.xpose.msra.mxu0 %v5880_v8  ;;  %v847_v36 = vand.u32 4294901760, %v5910_v38  ;;  %v5214_v15 = vpack.c.bf16 %v910_v46, %v898_v45  ;;  %v5983_v27 = vsub.f32 %v99_v7, %v1377_v13  ;;  %v130_v45 = vld [vmem:[#allocation5 + $0x1a0] sm:$0xff]  ;;  %v6010_v46 = vpack.c.bf16 %v1377_v13, %v1373_v9 }
  0x5e   :  { %673 = vmatprep.mubr.f32.mxu0 %v5781_v4  ;;  %5207 = vmatprep.subr.bf16.mxu0 %v5898_v19  ;;  %v857_v60 = vsub.f32 %v5921_v16, %v856_v21  ;;  %v5216_v37 = vpack.c.bf16 %v916_v59, %v904_v51 }
  0x5f   :  { %5211 = vmatprep.subr.bf16.mxu1 %v5210_v32  ;;  %v848_v23 = vsub.f32 %v5910_v38, %v847_v36 }
  0x60   :  { %675 = vmatmul.mubr.f32.gmra.mrb[10].mxu0 %v5783_v5 }
  0x61   :  { %844 = vmatprep.mubr.f32.mxu0 %v843_v41  ;;  %v114_v41 = vld [vmem:[#allocation5 + $0x120] sm:$0xff] }
  0x62   :  { %v1383_v44 = vand.u32 4294901760, %v114_v41 }
  0x64   :  { %755 = vmatmul.mubr.f32.vlgmr.msra.gmra.mrb[8].mxu1 %v5757_v53  ;;  %v849_v53 = vand.u32 4294901760, %v848_v23  ;;  %v67_v23 = vld [vmem:[#allocation2 + $0xa8] sm:$0xff] }
  0x65   :  { %5209 = vmatpush1.bf16.xpose.msra.mxu0 %v5928_v25  ;;  %5213 = vmatpush1.bf16.xpose.msra.mxu1 %v5212_v26  ;;  %v1387_v26 = vand.u32 4294901760, %v130_v45 }
  0x66   :  { %760 = vmatprep.mubr.f32.mxu1 %v5781_v4  ;;  %5215 = vmatprep.subr.bf16.mxu1 %v5214_v15  ;;  %v858_v4 = vand.u32 4294901760, %v857_v60  ;;  %v50_v15 = vld [vmem:[#allocation2 + $0x20] sm:$0xff] }
  0x67   :  { %5219 = vmatprep.subr.bf16.mxu0 %v5218_v29  ;;  %v6042_v59 = vsub.f32 %v130_v45, %v1387_v26 }
  0x68   :  { %762 = vmatmul.mubr.f32.gmra.mrb[10].mxu1 %v5783_v5  ;;  %v5224_v5 = vpack.c.bf16 %v5890_v12, %v5888_v22  ;;  %v1479_v22 = vsub.f32 %v5981_v18, %v1478_v0 }
  0x69   :  { %975 = vmatprep.mubr.f32.mxu1 %v5835_v30  ;;  %v1520_v7 = vand.u32 4294901760, %v6042_v59 }
  0x6a   :  { %v1480_v29 = vand.u32 4294901760, %v1479_v22 }
  0x6c   :  { %850 = vmatmul.mubr.f32.vlgmr.msra.gmra.mrb[12].mxu0 %v849_v53  ;;  %v6050_v53 = vpack.c.bf16 %v1385_v58, %v1381_v14 }
  0x6d   :  { %5217 = vmatpush1.bf16.xpose.msra.mxu1 %v5216_v37  ;;  %5221 = vmatpush1.bf16.xpose.msra.mxu0 %v5220_v57  ;;  %v6058_v37 = vand.u32 4294901760, %v67_v23 }
  0x6e   :  { %859 = vmatprep.mubr.f32.mxu0 %v858_v4  ;;  %5223 = vmatprep.subr.bf16.mxu0 %v5222_v63 }
  0x6f   :  { %5227 = vmatprep.subr.bf16.mxu1 %v5858_v61 }
  0x70   :  { %865 = vmatmul.mubr.f32.gmra.mrb[14].mxu0 %v864_v2 }
  0x71   :  { %1071 = vmatprep.mubr.f32.mxu0 %v5852_v55  ;;  %v1379_v55 = vand.u32 4294901760, %v98_v43 }
  0x73   :  { %v6001_v32 = vsub.f32 %v98_v43, %v1379_v55  ;;  %v6032_v51 = vpack.c.bf16 %v1379_v55, %v1375_v54  ;;  %v5266_v55 = vpack.c.bf16 %v5983_v27, %v5981_v18 }
  0x74   :  { %977 = vmatmul.mubr.f32.vlgmr.msra.gmra.mrb[12].mxu1 %v5885_v10 }
  0x75   :  { %5225 = vmatpush1.bf16.xpose.msra.mxu0 %v5224_v5  ;;  %5229 = vmatpush1.bf16.xpose.msra.mxu1 %v5880_v8  ;;  %v1496_v48 = vand.u32 4294901760, %v6001_v32 }
  0x76   :  { %982 = vmatprep.mubr.f32.mxu1 %v5906_v28  ;;  %5231 = vmatprep.subr.bf16.mxu1 %v5898_v19 }
  0x77   :  { %5235 = vmatprep.subr.bf16.mxu0 %v5234_v6  ;;  %v1497_v60 = vsub.f32 %v6001_v32, %v1496_v48  ;;  %v5284_v18 = vpack.c.bf16 %v1496_v48, %v1484_v42 }
  0x78   :  { %984 = vmatmul.mubr.f32.gmra.mrb[14].mxu1 %v5912_v39 }
  0x79   :  { %1163 = vmatprep.mubr.f32.mxu1 %v841_v1  ;;  %v1490_v1 = vand.u32 4294901760, %v5983_v27  ;;  %v1498_v5 = vand.u32 4294901760, %v1497_v60 }
  0x7b   :  { %v1491_v12 = vsub.f32 %v5983_v27, %v1490_v1  ;;  %v84_v27 = vld [vmem:[#allocation5 + $0x30] sm:$0xff] }
  0x7c   :  { %1074 = vmatmul.mubr.f32.vlgmr.msra.gmra.mrb[16].mxu0 %v5910_v38 }
  0x7d   :  { %5233 = vmatpush1.bf16.xpose.msra.mxu1 %v5928_v25  ;;  %5237 = vmatpush1.bf16.xpose.msra.mxu0 %v5236_v49  ;;  %v6073_v49 = vsub.f32 %v67_v23, %v6058_v37  ;;  %v101_v23 = vld [vmem:[#allocation5 + $0xb8] sm:$0xff] }
  0x7e   :  { %1080 = vmatprep.mubr.f32.mxu0 %v5921_v16  ;;  %5239 = vmatprep.subr.bf16.mxu0 %v5238_v35  ;;  %v1485_v16 = vsub.f32 %v5994_v62, %v1484_v42  ;;  %v6080_v35 = vpack.c.bf16 %v1387_v26, %v1383_v44  ;;  %v1983_v60 = vand.u32 4294901760, %v101_v23 }
  0x7f   :  { %5243 = vmatprep.subr.bf16.mxu1 %v5858_v61  ;;  %v6006_v61 = vsub.f32 %v115_v31, %v1381_v14  ;;  %v1521_v31 = vsub.f32 %v6042_v59, %v1520_v7  ;;  %v1462_v54 = vand.u32 4294901760, %v6073_v49 }
  0x80   :  { %1083 = vmatmul.mubr.f32.gmra.mrb[18].mxu0 %v5926_v17  ;;  %v1448_v17 = vsub.f32 %v6004_v33, %v1447_v52  ;;  %v1486_v4 = vand.u32 4294901760, %v1485_v16 }
  0x81   :  { %1272 = vmatprep.mubr.f32.mxu0 %v5835_v30  ;;  %v1502_v38 = vand.u32 4294901760, %v6006_v61  ;;  %v1463_v45 = vsub.f32 %v6073_v49, %v1462_v54  ;;  %v5270_v26 = vpack.c.bf16 %v6008_v40, %v6006_v61 }
  0x82   :  { %v1449_v6 = vand.u32 4294901760, %v1448_v17  ;;  %v5260_v43 = vpack.c.bf16 %v1498_v5, %v1486_v4  ;;  %v53_v17 = vld [vmem:[#allocation2 + $0x38] sm:$0xff] }
  0x83   :  { %v1503_v34 = vsub.f32 %v6006_v61, %v1502_v38  ;;  %v6139_v42 = vand.u32 4294901760, %v53_v17 }
  0x84   :  { %1167 = vmatmul.mubr.f32.vlgmr.msra.gmra.mrb[16].mxu1 %v847_v36  ;;  %v1514_v36 = vand.u32 4294901760, %v6008_v40 }
  0x85   :  { %5241 = vmatpush1.bf16.xpose.msra.mxu0 %v5240_v3  ;;  %5245 = vmatpush1.bf16.xpose.msra.mxu1 %v5880_v8  ;;  %v1492_v8 = vand.u32 4294901760, %v1491_v12  ;;  %v1504_v9 = vand.u32 4294901760, %v1503_v34  ;;  %v6135_v34 = vsub.f32 %v101_v23, %v1983_v60  ;;  %v6156_v4 = vsub.f32 %v53_v17, %v6139_v42 }
  0x86   :  { %1174 = vmatprep.mubr.f32.mxu1 %v856_v21  ;;  %5247 = vmatprep.subr.bf16.mxu1 %v5898_v19  ;;  %v6037_v21 = vand.u32 4294901760, %v50_v15  ;;  %v6040_v19 = vsub.f32 %v114_v41, %v1383_v44  ;;  %v1522_v41 = vand.u32 4294901760, %v1521_v31  ;;  %v5268_v44 = vpack.c.bf16 %v6001_v32, %v5994_v62  ;;  %v133_v62 = vld [vmem:[#allocation5 + $0x1b8] sm:$0xff] }
  0x87   :  { %5251 = vmatprep.subr.bf16.mxu0 %v6010_v46  ;;  %v5258_v57 = vpack.c.bf16 %v1492_v8, %v1480_v29  ;;  %v5282_v29 = vpack.c.bf16 %v1490_v1, %v1478_v0  ;;  %v85_v8 = vld [vmem:[#allocation5 + $0x38] sm:$0xff]  ;;  %v5286_v0 = vpack.c.bf16 %v1514_v36, %v1502_v38  ;;  %v100_v1 = vld [vmem:[#allocation5 + $0xb0] sm:$0xff]  ;;  %v1981_v32 = vand.u32 4294901760, %v84_v27 }
  0x88   :  { %1178 = vmatmul.mubr.f32.gmra.mrb[18].mxu1 %v862_v24  ;;  %v66_v24 = vld [vmem:[#allocation2 + $0xa0] sm:$0xff]  ;;  %v6062_v63 = vsub.f32 %v50_v15, %v6037_v21  ;;  %v1508_v20 = vand.u32 4294901760, %v6040_v19  ;;  %v1979_v16 = vand.u32 4294901760, %v85_v8  ;;  %v2053_v31 = vand.u32 4294901760, %v6156_v4 }
  0x89   :  { %1359 = vmatprep.mubr.f32.mxu1 %v5835_v30  ;;  %v1515_v30 = vsub.f32 %v6008_v40, %v1514_v36  ;;  %v6064_v2 = vand.u32 4294901760, %v66_v24  ;;  %v1991_v40 = vand.u32 4294901760, %v133_v62  ;;  %v6146_v38 = vsub.f32 %v84_v27, %v1981_v32 }
  0x8a   :  { %v1509_v11 = vsub.f32 %v6040_v19, %v1508_v20  ;;  %v5288_v36 = vpack.c.bf16 %v1520_v7, %v1508_v20 }
  0x8b   :  { %v1516_v13 = vand.u32 4294901760, %v1515_v30  ;;  %v6078_v50 = vsub.f32 %v66_v24, %v6064_v2  ;;  %v6133_v24 = vsub.f32 %v85_v8, %v1979_v16  ;;  %v117_v30 = vld [vmem:[#allocation5 + $0x138] sm:$0xff]  ;;  %v6160_v5 = vsub.f32 %v133_v62, %v1991_v40 }
  0x8c   :  { %1274 = vmatmul.mubr.f32.vlgmr.msra.gmra.mrb[20].mxu0 %v5885_v10  ;;  %v1510_v3 = vand.u32 4294901760, %v1509_v11  ;;  %v1987_v61 = vand.u32 4294901760, %v117_v30  ;;  %v2090_v20 = vand.u32 4294901760, %v6146_v38 }
  0x8d   :  { %5249 = vmatpush1.bf16.xpose.msra.mxu1 %v5928_v25  ;;  %5253 = vmatpush1.bf16.xpose.msra.mxu0 %v6032_v51  ;;  %v1453_v25 = vand.u32 4294901760, %v6062_v63  ;;  %v5262_v47 = vpack.c.bf16 %v1516_v13, %v1504_v9  ;;  %v1468_v58 = vand.u32 4294901760, %v6078_v50  ;;  %v2084_v48 = vand.u32 4294901760, %v6133_v24  ;;  %v132_v9 = vld [vmem:[#allocation5 + $0x1b0] sm:$0xff] }
  0x8e   :  { %1279 = vmatprep.mubr.f32.mxu0 %v5906_v28  ;;  %5255 = vmatprep.subr.bf16.mxu0 %v6050_v53  ;;  %v5264_v12 = vpack.c.bf16 %v1522_v41, %v1510_v3  ;;  %v6162_v13 = vpack.c.bf16 %v1983_v60, %v1979_v16 }
  0x8f   :  { %5259 = vmatprep.subr.bf16.mxu1 %v5258_v57  ;;  %v1454_v14 = vsub.f32 %v6062_v63, %v1453_v25  ;;  %v1469_v22 = vsub.f32 %v6078_v50, %v1468_v58 }
  0x90   :  { %1281 = vmatmul.mubr.f32.gmra.mrb[22].mxu0 %v5912_v39 }
  0x91   :  { %1450 = vmatprep.mubr.f32.mxu0 %v1449_v6  ;;  %v1470_v15 = vand.u32 4294901760, %v1469_v22  ;;  %v116_v6 = vld [vmem:[#allocation5 + $0x130] sm:$0xff] }
  0x92   :  { %v1989_v7 = vand.u32 4294901760, %v116_v6 }
  0x94   :  { %1361 = vmatmul.mubr.f32.vlgmr.msra.gmra.mrb[20].mxu1 %v5885_v10  ;;  %v1455_v10 = vand.u32 4294901760, %v1454_v14  ;;  %v69_v14 = vld [vmem:[#allocation2 + $0xb8] sm:$0xff] }
  0x95   :  { %5257 = vmatpush1.bf16.xpose.msra.mxu0 %v6080_v35  ;;  %5261 = vmatpush1.bf16.xpose.msra.mxu1 %v5260_v43  ;;  %v1993_v43 = vand.u32 4294901760, %v132_v9 }
  0x96   :  { %1366 = vmatprep.mubr.f32.mxu1 %v5906_v28  ;;  %5263 = vmatprep.subr.bf16.mxu1 %v5262_v47  ;;  %v1464_v28 = vand.u32 4294901760, %v1463_v45  ;;  %v52_v47 = vld [vmem:[#allocation2 + $0x30] sm:$0xff] }
  0x97   :  { %5267 = vmatprep.subr.bf16.mxu0 %v5266_v55  ;;  %v6194_v41 = vsub.f32 %v132_v9, %v1993_v43 }
  0x98   :  { %1368 = vmatmul.mubr.f32.gmra.mrb[22].mxu1 %v5912_v39  ;;  %v5272_v39 = vpack.c.bf16 %v6042_v59, %v6040_v19  ;;  %v2085_v19 = vsub.f32 %v6133_v24, %v2084_v48 }
  0x99   :  { %1581 = vmatprep.mubr.f32.mxu1 %v5987_v56  ;;  %v2126_v23 = vand.u32 4294901760, %v6194_v41 }
  0x9a   :  { %v2086_v55 = vand.u32 4294901760, %v2085_v19 }
  0x9c   :  { %1456 = vmatmul.mubr.f32.vlgmr.msra.gmra.mrb[24].mxu0 %v1455_v10  ;;  %v6202_v10 = vpack.c.bf16 %v1991_v40, %v1987_v61 }
  0x9d   :  { %5265 = vmatpush1.bf16.xpose.msra.mxu1 %v5264_v12  ;;  %5269 = vmatpush1.bf16.xpose.msra.mxu0 %v5268_v44  ;;  %v6210_v12 = vand.u32 4294901760, %v69_v14 }
  0x9e   :  { %1465 = vmatprep.mubr.f32.mxu0 %v1464_v28  ;;  %5271 = vmatprep.subr.bf16.mxu0 %v5270_v26 }
  0x9f   :  { %5275 = vmatprep.subr.bf16.mxu1 %v6010_v46 }
  0xa0   :  { %1471 = vmatmul.mubr.f32.gmra.mrb[26].mxu0 %v1470_v15 }
  0xa1   :  { %1677 = vmatprep.mubr.f32.mxu0 %v6004_v33  ;;  %v1985_v33 = vand.u32 4294901760, %v100_v1 }
  0xa3   :  { %v6153_v57 = vsub.f32 %v100_v1, %v1985_v33  ;;  %v6184_v3 = vpack.c.bf16 %v1985_v33, %v1981_v32  ;;  %v5314_v33 = vpack.c.bf16 %v6135_v34, %v6133_v24 }
  0xa4   :  { %1583 = vmatmul.mubr.f32.vlgmr.msra.gmra.mrb[24].mxu1 %v6037_v21 }
  0xa5   :  { %5273 = vmatpush1.bf16.xpose.msra.mxu0 %v5272_v39  ;;  %5277 = vmatpush1.bf16.xpose.msra.mxu1 %v6032_v51  ;;  %v2102_v11 = vand.u32 4294901760, %v6153_v57 }
  0xa6   :  { %1588 = vmatprep.mubr.f32.mxu1 %v6058_v37  ;;  %5279 = vmatprep.subr.bf16.mxu1 %v6050_v53 }
  0xa7   :  { %5283 = vmatprep.subr.bf16.mxu0 %v5282_v29  ;;  %v2103_v45 = vsub.f32 %v6153_v57, %v2102_v11  ;;  %v5332_v24 = vpack.c.bf16 %v2102_v11, %v2090_v20 }
  0xa8   :  { %1590 = vmatmul.mubr.f32.gmra.mrb[26].mxu1 %v6064_v2 }
  0xa9   :  { %1769 = vmatprep.mubr.f32.mxu1 %v1447_v52  ;;  %v2096_v52 = vand.u32 4294901760, %v6135_v34  ;;  %v2104_v39 = vand.u32 4294901760, %v2103_v45 }
  0xab   :  { %v2097_v59 = vsub.f32 %v6135_v34, %v2096_v52  ;;  %v86_v34 = vld [vmem:[#allocation5 + $0x40] sm:$0xff] }
  0xac   :  { %1680 = vmatmul.mubr.f32.vlgmr.msra.gmra.mrb[28].mxu0 %v6062_v63 }
  0xad   :  { %5281 = vmatpush1.bf16.xpose.msra.mxu1 %v6080_v35  ;;  %5285 = vmatpush1.bf16.xpose.msra.mxu0 %v5284_v18  ;;  %v6225_v18 = vsub.f32 %v69_v14, %v6210_v12  ;;  %v103_v14 = vld [vmem:[#allocation5 + $0xc8] sm:$0xff] }
  0xae   :  { %1686 = vmatprep.mubr.f32.mxu0 %v6073_v49  ;;  %5287 = vmatprep.subr.bf16.mxu0 %v5286_v0  ;;  %v2091_v49 = vsub.f32 %v6146_v38, %v2090_v20  ;;  %v6232_v0 = vpack.c.bf16 %v1993_v43, %v1989_v7  ;;  %v2589_v45 = vand.u32 4294901760, %v103_v14 }
  0xaf   :  { %5291 = vmatprep.subr.bf16.mxu1 %v6010_v46  ;;  %v6158_v46 = vsub.f32 %v117_v30, %v1987_v61  ;;  %v2127_v30 = vsub.f32 %v6194_v41, %v2126_v23  ;;  %v2068_v32 = vand.u32 4294901760, %v6225_v18 }
  0xb0   :  { %1689 = vmatmul.mubr.f32.gmra.mrb[30].mxu0 %v6078_v50  ;;  %v2054_v50 = vsub.f32 %v6156_v4, %v2053_v31  ;;  %v2092_v28 = vand.u32 4294901760, %v2091_v49 }
  0xb1   :  { %1878 = vmatprep.mubr.f32.mxu0 %v5987_v56  ;;  %v2108_v63 = vand.u32 4294901760, %v6158_v46  ;;  %v2069_v9 = vsub.f32 %v6225_v18, %v2068_v32  ;;  %v5318_v43 = vpack.c.bf16 %v6160_v5, %v6158_v46 }
  0xb2   :  { %v2055_v29 = vand.u32 4294901760, %v2054_v50  ;;  %v5308_v1 = vpack.c.bf16 %v2104_v39, %v2092_v28  ;;  %v55_v50 = vld [vmem:[#allocation2 + $0x48] sm:$0xff] }
  0xb3   :  { %v2109_v22 = vsub.f32 %v6158_v46, %v2108_v63  ;;  %v6291_v20 = vand.u32 4294901760, %v55_v50 }
  0xb4   :  { %1773 = vmatmul.mubr.f32.vlgmr.msra.gmra.mrb[28].mxu1 %v1453_v25  ;;  %v2120_v25 = vand.u32 4294901760, %v6160_v5 }
  0xb5   :  { %5289 = vmatpush1.bf16.xpose.msra.mxu0 %v5288_v36  ;;  %5293 = vmatpush1.bf16.xpose.msra.mxu1 %v6032_v51  ;;  %v2098_v51 = vand.u32 4294901760, %v2097_v59  ;;  %v2110_v16 = vand.u32 4294901760, %v2109_v22  ;;  %v6287_v22 = vsub.f32 %v103_v14, %v2589_v45  ;;  %v6308_v28 = vsub.f32 %v55_v50, %v6291_v20 }
  0xb6   :  { %1780 = vmatprep.mubr.f32.mxu1 %v1462_v54  ;;  %5295 = vmatprep.subr.bf16.mxu1 %v6050_v53  ;;  %v6189_v54 = vand.u32 4294901760, %v52_v47  ;;  %v6192_v53 = vsub.f32 %v116_v6, %v1989_v7  ;;  %v2128_v6 = vand.u32 4294901760, %v2127_v30  ;;  %v5316_v7 = vpack.c.bf16 %v6153_v57, %v6146_v38  ;;  %v135_v38 = vld [vmem:[#allocation5 + $0x1c8] sm:$0xff] }
  0xb7   :  { %5299 = vmatprep.subr.bf16.mxu0 %v6162_v13  ;;  %v5306_v44 = vpack.c.bf16 %v2098_v51, %v2086_v55  ;;  %v5330_v55 = vpack.c.bf16 %v2096_v52, %v2084_v48  ;;  %v87_v51 = vld [vmem:[#allocation5 + $0x48] sm:$0xff]  ;;  %v5334_v48 = vpack.c.bf16 %v2120_v25, %v2108_v63  ;;  %v102_v52 = vld [vmem:[#allocation5 + $0xc0] sm:$0xff]  ;;  %v2587_v57 = vand.u32 4294901760, %v86_v34 }
  0xb8   :  { %1784 = vmatmul.mubr.f32.gmra.mrb[30].mxu1 %v1468_v58  ;;  %v68_v58 = vld [vmem:[#allocation2 + $0xb0] sm:$0xff]  ;;  %v6214_v26 = vsub.f32 %v52_v47, %v6189_v54  ;;  %v2114_v8 = vand.u32 4294901760, %v6192_v53  ;;  %v2585_v49 = vand.u32 4294901760, %v87_v51  ;;  %v2659_v30 = vand.u32 4294901760, %v6308_v28 }
  0xb9   :  { %1965 = vmatprep.mubr.f32.mxu1 %v5987_v56  ;;  %v2121_v56 = vsub.f32 %v6160_v5, %v2120_v25  ;;  %v6216_v15 = vand.u32 4294901760, %v68_v58  ;;  %v2597_v5 = vand.u32 4294901760, %v135_v38  ;;  %v6298_v63 = vsub.f32 %v86_v34, %v2587_v57 }
  0xba   :  { %v2115_v17 = vsub.f32 %v6192_v53, %v2114_v8  ;;  %v5336_v25 = vpack.c.bf16 %v2126_v23, %v2114_v8 }
  0xbb   :  { %v2122_v60 = vand.u32 4294901760, %v2121_v56  ;;  %v6230_v27 = vsub.f32 %v68_v58, %v6216_v15  ;;  %v6285_v58 = vsub.f32 %v87_v51, %v2585_v49  ;;  %v119_v56 = vld [vmem:[#allocation5 + $0x148] sm:$0xff]  ;;  %v6312_v39 = vsub.f32 %v135_v38, %v2597_v5 }
  0xbc   :  { %1880 = vmatmul.mubr.f32.vlgmr.msra.gmra.mrb[32].mxu0 %v6037_v21  ;;  %v2116_v36 = vand.u32 4294901760, %v2115_v17  ;;  %v2593_v46 = vand.u32 4294901760, %v119_v56  ;;  %v2696_v8 = vand.u32 4294901760, %v6298_v63 }
  0xbd   :  { %5297 = vmatpush1.bf16.xpose.msra.mxu1 %v6080_v35  ;;  %5301 = vmatpush1.bf16.xpose.msra.mxu0 %v6184_v3  ;;  %v2059_v35 = vand.u32 4294901760, %v6214_v26  ;;  %v5310_v62 = vpack.c.bf16 %v2122_v60, %v2110_v16  ;;  %v2074_v40 = vand.u32 4294901760, %v6230_v27  ;;  %v2690_v11 = vand.u32 4294901760, %v6285_v58  ;;  %v134_v16 = vld [vmem:[#allocation5 + $0x1c0] sm:$0xff] }
  0xbe   :  { %1885 = vmatprep.mubr.f32.mxu0 %v6058_v37  ;;  %5303 = vmatprep.subr.bf16.mxu0 %v6202_v10  ;;  %v5312_v59 = vpack.c.bf16 %v2128_v6, %v2116_v36  ;;  %v6314_v60 = vpack.c.bf16 %v2589_v45, %v2585_v49 }
  0xbf   :  { %5307 = vmatprep.subr.bf16.mxu1 %v5306_v44  ;;  %v2060_v61 = vsub.f32 %v6214_v26, %v2059_v35  ;;  %v2075_v19 = vsub.f32 %v6230_v27, %v2074_v40 }
  0xc0   :  { %1887 = vmatmul.mubr.f32.gmra.mrb[34].mxu0 %v6064_v2 }
  0xc1   :  { %2056 = vmatprep.mubr.f32.mxu0 %v2055_v29  ;;  %v2076_v47 = vand.u32 4294901760, %v2075_v19  ;;  %v118_v29 = vld [vmem:[#allocation5 + $0x140] sm:$0xff] }
  0xc2   :  { %v2595_v23 = vand.u32 4294901760, %v118_v29 }
  0xc4   :  { %1967 = vmatmul.mubr.f32.vlgmr.msra.gmra.mrb[32].mxu1 %v6037_v21  ;;  %v2061_v21 = vand.u32 4294901760, %v2060_v61  ;;  %v71_v61 = vld [vmem:[#allocation2 + $0xc8] sm:$0xff] }
  0xc5   :  { %5305 = vmatpush1.bf16.xpose.msra.mxu0 %v6232_v0  ;;  %5309 = vmatpush1.bf16.xpose.msra.mxu1 %v5308_v1  ;;  %v2599_v1 = vand.u32 4294901760, %v134_v16 }
  0xc6   :  { %1972 = vmatprep.mubr.f32.mxu1 %v6058_v37  ;;  %5311 = vmatprep.subr.bf16.mxu1 %v5310_v62  ;;  %v2070_v37 = vand.u32 4294901760, %v2069_v9  ;;  %v54_v62 = vld [vmem:[#allocation2 + $0x40] sm:$0xff] }
  0xc7   :  { %5315 = vmatprep.subr.bf16.mxu0 %v5314_v33  ;;  %v6346_v6 = vsub.f32 %v134_v16, %v2599_v1 }
  0xc8   :  { %1974 = vmatmul.mubr.f32.gmra.mrb[34].mxu1 %v6064_v2  ;;  %v5320_v2 = vpack.c.bf16 %v6194_v41, %v6192_v53  ;;  %v2691_v53 = vsub.f32 %v6285_v58, %v2690_v11 }
  0xc9   :  { %2187 = vmatprep.mubr.f32.mxu1 %v6139_v42  ;;  %v2732_v14 = vand.u32 4294901760, %v6346_v6 }
  0xca   :  { %v2692_v33 = vand.u32 4294901760, %v2691_v53 }
  0xcc   :  { %2062 = vmatmul.mubr.f32.vlgmr.msra.gmra.mrb[36].mxu0 %v2061_v21  ;;  %v6354_v21 = vpack.c.bf16 %v2597_v5, %v2593_v46 }
  0xcd   :  { %5313 = vmatpush1.bf16.xpose.msra.mxu1 %v5312_v59  ;;  %5317 = vmatpush1.bf16.xpose.msra.mxu0 %v5316_v7  ;;  %v6362_v59 = vand.u32 4294901760, %v71_v61 }
  0xce   :  { %2071 = vmatprep.mubr.f32.mxu0 %v2070_v37  ;;  %5319 = vmatprep.subr.bf16.mxu0 %v5318_v43 }
  0xcf   :  { %5323 = vmatprep.subr.bf16.mxu1 %v6162_v13 }
  0xd0   :  { %2077 = vmatmul.mubr.f32.gmra.mrb[38].mxu0 %v2076_v47 }
  0xd1   :  { %2283 = vmatprep.mubr.f32.mxu0 %v6156_v4  ;;  %v2591_v4 = vand.u32 4294901760, %v102_v52 }
  0xd3   :  { %v6305_v44 = vsub.f32 %v102_v52, %v2591_v4  ;;  %v6336_v36 = vpack.c.bf16 %v2591_v4, %v2587_v57  ;;  %v5362_v4 = vpack.c.bf16 %v6287_v22, %v6285_v58 }
  0xd4   :  { %2189 = vmatmul.mubr.f32.vlgmr.msra.gmra.mrb[36].mxu1 %v6189_v54 }
  0xd5   :  { %5321 = vmatpush1.bf16.xpose.msra.mxu0 %v5320_v2  ;;  %5325 = vmatpush1.bf16.xpose.msra.mxu1 %v6184_v3  ;;  %v2708_v17 = vand.u32 4294901760, %v6305_v44 }
  0xd6   :  { %2194 = vmatprep.mubr.f32.mxu1 %v6210_v12  ;;  %5327 = vmatprep.subr.bf16.mxu1 %v6202_v10 }
  0xd7   :  { %5331 = vmatprep.subr.bf16.mxu0 %v5330_v55  ;;  %v2709_v9 = vsub.f32 %v6305_v44, %v2708_v17  ;;  %v5380_v58 = vpack.c.bf16 %v2708_v17, %v2696_v8 }
  0xd8   :  { %2196 = vmatmul.mubr.f32.gmra.mrb[38].mxu1 %v6216_v15 }
  0xd9   :  { %2375 = vmatprep.mubr.f32.mxu1 %v2053_v31  ;;  %v2702_v31 = vand.u32 4294901760, %v6287_v22  ;;  %v2710_v2 = vand.u32 4294901760, %v2709_v9 }
  0xdb   :  { %v2703_v41 = vsub.f32 %v6287_v22, %v2702_v31  ;;  %v88_v22 = vld [vmem:[#allocation5 + $0x50] sm:$0xff] }
  0xdc   :  { %2286 = vmatmul.mubr.f32.vlgmr.msra.gmra.mrb[40].mxu0 %v6214_v26 }
  0xdd   :  { %5329 = vmatpush1.bf16.xpose.msra.mxu1 %v6232_v0  ;;  %5333 = vmatpush1.bf16.xpose.msra.mxu0 %v5332_v24  ;;  %v6377_v24 = vsub.f32 %v71_v61, %v6362_v59  ;;  %v105_v61 = vld [vmem:[#allocation5 + $0xd8] sm:$0xff] }
  0xde   :  { %2292 = vmatprep.mubr.f32.mxu0 %v6225_v18  ;;  %5335 = vmatprep.subr.bf16.mxu0 %v5334_v48  ;;  %v2697_v18 = vsub.f32 %v6298_v63, %v2696_v8  ;;  %v6384_v48 = vpack.c.bf16 %v2599_v1, %v2595_v23  ;;  %v3195_v9 = vand.u32 4294901760, %v105_v61 }
  0xdf   :  { %5339 = vmatprep.subr.bf16.mxu1 %v6162_v13  ;;  %v6310_v13 = vsub.f32 %v119_v56, %v2593_v46  ;;  %v2733_v56 = vsub.f32 %v6346_v6, %v2732_v14  ;;  %v2674_v57 = vand.u32 4294901760, %v6377_v24 }
  0xe0   :  { %2295 = vmatmul.mubr.f32.gmra.mrb[42].mxu0 %v6230_v27  ;;  %v2660_v27 = vsub.f32 %v6308_v28, %v2659_v30  ;;  %v2698_v37 = vand.u32 4294901760, %v2697_v18 }
  0xe1   :  { %2484 = vmatprep.mubr.f32.mxu0 %v6139_v42  ;;  %v2714_v26 = vand.u32 4294901760, %v6310_v13  ;;  %v2675_v16 = vsub.f32 %v6377_v24, %v2674_v57  ;;  %v5366_v1 = vpack.c.bf16 %v6312_v39, %v6310_v13 }
  0xe2   :  { %v2661_v55 = vand.u32 4294901760, %v2660_v27  ;;  %v5356_v52 = vpack.c.bf16 %v2710_v2, %v2698_v37  ;;  %v57_v27 = vld [vmem:[#allocation2 + $0x58] sm:$0xff] }
  0xe3   :  { %v2715_v19 = vsub.f32 %v6310_v13, %v2714_v26  ;;  %v148_v13 = vpop.permute.xlu0 %147  ;;  %v6450_v8 = vand.u32 4294901760, %v57_v27 }
  0xe4   :  { %2379 = vmatmul.mubr.f32.vlgmr.msra.gmra.mrb[40].mxu1 %v2059_v35  ;;  %v2726_v35 = vand.u32 4294901760, %v6312_v39 }
  0xe5   :  { %5337 = vmatpush1.bf16.xpose.msra.mxu0 %v5336_v25  ;;  %5341 = vmatpush1.bf16.xpose.msra.mxu1 %v6184_v3  ;;  %v2704_v3 = vand.u32 4294901760, %v2703_v41  ;;  %v2716_v49 = vand.u32 4294901760, %v2715_v19  ;;  %v6439_v19 = vsub.f32 %v105_v61, %v3195_v9 }
  0xe6   :  { %2386 = vmatprep.mubr.f32.mxu1 %v2068_v32  ;;  %5343 = vmatprep.subr.bf16.mxu1 %v6202_v10  ;;  %v6341_v32 = vand.u32 4294901760, %v54_v62  ;;  %v6344_v10 = vsub.f32 %v118_v29, %v2595_v23  ;;  %v2734_v29 = vand.u32 4294901760, %v2733_v56  ;;  %v5364_v23 = vpack.c.bf16 %v6305_v44, %v6298_v63  ;;  %v6443_v63 = vld [vmem:[#allocation5 + $0x1d8] sm:$0xff] }
  0xe7   :  { %5347 = vmatprep.subr.bf16.mxu0 %v6314_v60  ;;  %v5354_v7 = vpack.c.bf16 %v2704_v3, %v2692_v33  ;;  %v5378_v33 = vpack.c.bf16 %v2702_v31, %v2690_v11  ;;  %v89_v3 = vld [vmem:[#allocation5 + $0x58] sm:$0xff]  ;;  %v5382_v11 = vpack.c.bf16 %v2726_v35, %v2714_v26  ;;  %v104_v31 = vld [vmem:[#allocation5 + $0xd0] sm:$0xff]  ;;  %v3193_v44 = vand.u32 4294901760, %v88_v22 }
  0xe8   :  { %2390 = vmatmul.mubr.f32.gmra.mrb[42].mxu1 %v2074_v40  ;;  %v70_v40 = vld [vmem:[#allocation2 + $0xc0] sm:$0xff]  ;;  %v6366_v43 = vsub.f32 %v54_v62, %v6341_v32  ;;  %v2720_v51 = vand.u32 4294901760, %v6344_v10  ;;  %v3191_v18 = vand.u32 4294901760, %v89_v3 }
  0xe9   :  { %2571 = vmatprep.mubr.f32.mxu1 %v6139_v42  ;;  %v2727_v42 = vsub.f32 %v6312_v39, %v2726_v35  ;;  %v6368_v47 = vand.u32 4294901760, %v70_v40  ;;  %v3197_v39 = vand.u32 4294901760, %v104_v31 }
  0xea   :  { %v2721_v50 = vsub.f32 %v6344_v10, %v2720_v51 }
  0xeb   :  { %v2728_v45 = vand.u32 4294901760, %v2727_v42  ;;  %v6382_v34 = vsub.f32 %v70_v40, %v6368_v47  ;;  %v6437_v40 = vsub.f32 %v89_v3, %v3191_v18  ;;  %v6441_v42 = vld [vmem:[#allocation5 + $0x158] sm:$0xff] }
  0xec   :  { %2486 = vmatmul.mubr.f32.vlgmr.msra.gmra.mrb[44].mxu0 %v6189_v54  ;;  %v2722_v25 = vand.u32 4294901760, %v2721_v50  ;;  %v3199_v17 = vand.u32 4294901760, %v6441_v42 }
  0xed   :  { %5345 = vmatpush1.bf16.xpose.msra.mxu1 %v6232_v0  ;;  %5349 = vmatpush1.bf16.xpose.msra.mxu0 %v6336_v36  ;;  %v2665_v0 = vand.u32 4294901760, %v6366_v43  ;;  %v5358_v38 = vpack.c.bf16 %v2728_v45, %v2716_v49  ;;  %v2680_v5 = vand.u32 4294901760, %v6382_v34  ;;  %v3296_v35 = vand.u32 4294901760, %v6437_v40 }
  0xee   :  { %2491 = vmatprep.mubr.f32.mxu0 %v6210_v12  ;;  %5351 = vmatprep.subr.bf16.mxu0 %v6354_v21  ;;  %v5360_v41 = vpack.c.bf16 %v2734_v29, %v2722_v25  ;;  %v5384_v49 = vpack.c.bf16 %v2732_v14, %v2720_v51  ;;  %v6466_v45 = vsub.f32 %v104_v31, %v3197_v39 }
  0xef   :  { %5355 = vmatprep.subr.bf16.mxu1 %v5354_v7  ;;  %v2666_v46 = vsub.f32 %v6366_v43, %v2665_v0  ;;  %v2681_v53 = vsub.f32 %v6382_v34, %v2680_v5  ;;  %v3308_v7 = vand.u32 4294901760, %v6439_v19  ;;  %v6472_v50 = vsub.f32 %v6441_v42, %v3199_v17 }
  0xf0   :  { %2493 = vmatmul.mubr.f32.gmra.mrb[46].mxu0 %v6216_v15  ;;  %v3297_v51 = vsub.f32 %v6437_v40, %v3296_v35 }
  0xf1   :  { %2662 = vmatprep.mubr.f32.mxu0 %v2661_v55  ;;  %v2682_v62 = vand.u32 4294901760, %v2681_v53  ;;  %v6459_v55 = vsub.f32 %v88_v22, %v3193_v44  ;;  %v3309_v14 = vsub.f32 %v6439_v19, %v3308_v7 }
  0xf3   :  { %v3302_v29 = vand.u32 4294901760, %v6459_v55 }
  0xf4   :  { %2573 = vmatmul.mubr.f32.vlgmr.msra.gmra.mrb[44].mxu1 %v6189_v54  ;;  %v2667_v54 = vand.u32 4294901760, %v2666_v46 }
  0xf5   :  { %5353 = vmatpush1.bf16.xpose.msra.mxu0 %v6384_v48  ;;  %5357 = vmatpush1.bf16.xpose.msra.mxu1 %v5356_v52  ;;  %v6469_v52 = vsub.f32 %v57_v27, %v6450_v8 }
  0xf6   :  { %2578 = vmatprep.mubr.f32.mxu1 %v6210_v12  ;;  %5359 = vmatprep.subr.bf16.mxu1 %v5358_v38  ;;  %v2676_v12 = vand.u32 4294901760, %v2675_v16  ;;  %v6477_v38 = vld [vmem:[#allocation5 + $0x150] sm:$0xff] }
  0xf7   :  { %5363 = vmatprep.subr.bf16.mxu0 %v5362_v4 }
  0xf8   :  { %2580 = vmatmul.mubr.f32.gmra.mrb[46].mxu1 %v6216_v15  ;;  %v5368_v15 = vpack.c.bf16 %v6346_v6, %v6344_v10  ;;  %v6479_v10 = vld [vmem:[#allocation5 + $0x1d0] sm:$0xff]  ;;  %v6481_v6 = vpack.c.bf16 %v3195_v9, %v3191_v18 }
  0xf9   :  { %2793 = vmatprep.mubr.f32.mxu1 %v6291_v20  ;;  %v3205_v53 = vand.u32 4294901760, %v6479_v10 }
  0xfb   :  { %v6517_v9 = vsub.f32 %v6479_v10, %v3205_v53 }
  0xfc   :  { %2668 = vmatmul.mubr.f32.vlgmr.msra.gmra.mrb[48].mxu0 %v2667_v54  ;;  %v3201_v54 = vand.u32 4294901760, %v6477_v38 }
  0xfd   :  { %5361 = vmatpush1.bf16.xpose.msra.mxu1 %v5360_v41  ;;  %5365 = vmatpush1.bf16.xpose.msra.mxu0 %v5364_v23  ;;  %v3314_v41 = vand.u32 4294901760, %v6466_v45  ;;  %v3265_v23 = vand.u32 4294901760, %v6469_v52 }
  0xfe   :  { %2677 = vmatprep.mubr.f32.mxu0 %v2676_v12  ;;  %5367 = vmatprep.subr.bf16.mxu0 %v5366_v1  ;;  %v56_v12 = vld [vmem:[#allocation2 + $0x50] sm:$0xff]  ;;  %v6503_v1 = vpack.c.bf16 %v3197_v39, %v3193_v44  ;;  %v6514_v18 = vsub.f32 %v6477_v38, %v3201_v54 }
  0xff   :  { %5371 = vmatprep.subr.bf16.mxu1 %v6314_v60 }
 0x100   :  { %2683 = vmatmul.mubr.f32.gmra.mrb[50].mxu0 %v2682_v62  ;;  %v3298_v62 = vand.u32 4294901760, %v3297_v51 }
 0x101   :  { %2889 = vmatprep.mubr.f32.mxu0 %v6308_v28  ;;  %v5146_v28 = vld [vmem:[%s7052_s3] ss:$0 sm:$0xff] }
 0x102   :  { %v159_v37 = vmul.f32 %v5146_v28, %v148_v13 }
 0x104   :  { %2795 = vmatmul.mubr.f32.vlgmr.msra.gmra.mrb[48].mxu1 %v6341_v32 }
 0x105   :  { %5369 = vmatpush1.bf16.xpose.msra.mxu0 %v5368_v15  ;;  %5373 = vmatpush1.bf16.xpose.msra.mxu1 %v6336_v36  ;;  %v3310_v15 = vand.u32 4294901760, %v3309_v14 }
 0x106   :  { %2800 = vmatprep.mubr.f32.mxu1 %v6362_v59  ;;  %5375 = vmatprep.subr.bf16.mxu1 %v6354_v21 }
 0x107   :  { %5379 = vmatprep.subr.bf16.mxu0 %v5378_v33  ;;  %v73_v33 = vld [vmem:[#allocation2 + $0xd8] sm:$0xff]  ;;  %v5402_v42 = vpack.c.bf16 %v3310_v15, %v3298_v62  ;;  %v5410_v15 = vpack.c.bf16 %v6439_v19, %v6437_v40 }
 0x108   :  { %2802 = vmatmul.mubr.f32.gmra.mrb[50].mxu1 %v6368_v47  ;;  %v6533_v31 = vand.u32 4294901760, %v73_v33 }
 0x109   :  { %2981 = vmatprep.mubr.f32.mxu1 %v2659_v30  ;;  %v3203_v30 = vand.u32 4294901760, %v6443_v63 }
 0x10b   :  { %v6475_v56 = vsub.f32 %v6443_v63, %v3203_v30  ;;  %v6525_v22 = vpack.c.bf16 %v3203_v30, %v3199_v17 }
 0x10c   :  { %2892 = vmatmul.mubr.f32.vlgmr.msra.gmra.mrb[52].mxu0 %v6366_v43  ;;  %v3320_v43 = vand.u32 4294901760, %v6472_v50 }
 0x10d   :  { %5377 = vmatpush1.bf16.xpose.msra.mxu1 %v6384_v48  ;;  %5381 = vmatpush1.bf16.xpose.msra.mxu0 %v5380_v58  ;;  %v72_v58 = vld [vmem:[#allocation2 + $0xd0] sm:$0xff] }
 0x10e   :  { %2898 = vmatprep.mubr.f32.mxu0 %v6377_v24  ;;  %5383 = vmatprep.subr.bf16.mxu0 %v5382_v11  ;;  %v6539_v39 = vand.u32 4294901760, %v72_v58 }
 0x10f   :  { %5387 = vmatprep.subr.bf16.mxu1 %v6314_v60  ;;  %v245_v26 = vpop.f32.mrb[0].mxu0  ;;  %v153_v60 = vpop.permute.xlu0 %152 }
 0x110   :  { %2901 = vmatmul.mubr.f32.gmra.mrb[54].mxu0 %v6382_v34  ;;  %v247_v2 = vpop.f32.mrb[1].mxu0  ;;  %v246_v4 = vadd.f32 %v245_v26, %v159_v37  ;;  %v160_v25 = vmul.f32 %v5146_v28, %v153_v60  ;;  %v3315_v34 = vsub.f32 %v6466_v45, %v3314_v41  ;;  %v3326_v26 = vand.u32 4294901760, %v6514_v18 }
 0x111   :  { %3090 = vmatprep.mubr.f32.mxu0 %v6291_v20  ;;  %v3338_v37 = vand.u32 4294901760, %v6517_v9  ;;  %v6548_v60 = vsub.f32 %v73_v33, %v6533_v31  ;;  %v6553_v14 = vsub.f32 %v72_v58, %v6539_v39 }
 0x112   :  { %v3316_v17 = vand.u32 4294901760, %v3315_v34 }
 0x113   :  { %v260_v46 = vpop.f32.mrb[2].mxu0 }
 0x114   :  { %2985 = vmatmul.mubr.f32.vlgmr.msra.gmra.mrb[52].mxu1 %v2665_v0  ;;  %v262_v16 = vpop.f32.mrb[3].mxu0  ;;  %v3332_v0 = vand.u32 4294901760, %v6475_v56  ;;  %v261_v24 = vadd.f32 %v260_v46, %v160_v25  ;;  %v3327_v25 = vsub.f32 %v6514_v18, %v3326_v26 }
 0x115   :  { %5385 = vmatpush1.bf16.xpose.msra.mxu0 %v5384_v49  ;;  %5389 = vmatpush1.bf16.xpose.msra.mxu1 %v6336_v36  ;;  %v3339_v16 = vsub.f32 %v6517_v9, %v3338_v37 }
 0x116   :  { %2992 = vmatprep.mubr.f32.mxu1 %v2674_v57  ;;  %5391 = vmatprep.subr.bf16.mxu1 %v6354_v21  ;;  %v3303_v21 = vsub.f32 %v6459_v55, %v3302_v29  ;;  %v6510_v57 = vand.u32 4294901760, %v56_v12  ;;  %v3333_v11 = vsub.f32 %v6475_v56, %v3332_v0 }
 0x117   :  { %v372_v36 = vpop.f32.mrb[0].mxu1  ;;  %5395 = vmatprep.subr.bf16.mxu0 %v6481_v6 }
 0x118   :  { %v373_v3 = vadd.f32 %v372_v36, %v246_v4  ;;  %v374_v61 = vpop.f32.mrb[1].mxu1  ;;  %2996 = vmatmul.mubr.f32.gmra.mrb[54].mxu1 %v2680_v5  ;;  %v3266_v5 = vsub.f32 %v6469_v52, %v3265_v23  ;;  %v3304_v28 = vand.u32 4294901760, %v3303_v21  ;;  %v6537_v13 = vsub.f32 %v56_v12, %v6510_v57 }
 0x119   :  { %3177 = vmatprep.mubr.f32.mxu1 %v6291_v20  ;;  %v3321_v20 = vsub.f32 %v6472_v50, %v3320_v43  ;;  %v3334_v49 = vand.u32 4294901760, %v3333_v11  ;;  %v6555_v4 = vpack.c.bf16 %v3205_v53, %v3201_v54  ;;  %v3280_v36 = vand.u32 4294901760, %v6548_v60 }
 0x11a   :  { %v3267_v30 = vand.u32 4294901760, %v3266_v5  ;;  %v3271_v51 = vand.u32 4294901760, %v6537_v13  ;;  %v5404_v46 = vpack.c.bf16 %v3316_v17, %v3304_v28  ;;  %v3328_v61 = vand.u32 4294901760, %v3327_v25  ;;  %v91_v25 = vld [vmem:[#allocation5 + $0x68] sm:$0xff] }
 0x11b   :  { %v379_v27 = vpop.f32.mrb[2].mxu1  ;;  %v3322_v2 = vand.u32 4294901760, %v3321_v20 }
 0x11c   :  { %3092 = vmatmul.mubr.f32.vlgmr.msra.gmra.mrb[56].mxu0 %v6341_v32  ;;  %v380_v63 = vadd.f32 %v379_v27, %v261_v24  ;;  %v381_v44 = vpop.f32.mrb[3].mxu1  ;;  %v3272_v53 = vsub.f32 %v6537_v13, %v3271_v51  ;;  %v3340_v24 = vand.u32 4294901760, %v3339_v16  ;;  %v107_v16 = vld [vmem:[#allocation5 + $0xe8] sm:$0xff] }
 0x11d   :  { %5393 = vmatpush1.bf16.xpose.msra.mxu1 %v6384_v48  ;;  %5397 = vmatpush1.bf16.xpose.msra.mxu0 %v6503_v1  ;;  %v5406_v12 = vpack.c.bf16 %v3334_v49, %v3322_v2  ;;  %v5416_v49 = vpack.c.bf16 %v6517_v9, %v6514_v18  ;;  %v3801_v40 = vand.u32 4294901760, %v107_v16  ;;  %v6655_v18 = vld [vmem:[#allocation5 + $0x1e0] sm:$0xff] }
 0x11e   :  { %3097 = vmatprep.mubr.f32.mxu0 %v6362_v59  ;;  %5399 = vmatprep.subr.bf16.mxu0 %v6525_v22  ;;  %v3273_v58 = vand.u32 4294901760, %v3272_v53  ;;  %v5408_v11 = vpack.c.bf16 %v3340_v24, %v3328_v61  ;;  %v6610_v53 = vld [vmem:[#allocation5 + $0xe0] sm:$0xff] }
 0x11f   :  { %v469_v38 = vpop.f32.mrb[4].mxu0  ;;  %5403 = vmatprep.subr.bf16.mxu1 %v5402_v42  ;;  %v5414_v42 = vpack.c.bf16 %v6475_v56, %v6472_v50  ;;  %v3803_v56 = vand.u32 4294901760, %v6610_v53 }
 0x120   :  { %v470_v48 = vadd.f32 %v469_v38, %v373_v3  ;;  %3099 = vmatmul.mubr.f32.gmra.mrb[58].mxu0 %v6368_v47  ;;  %v471_v10 = vpop.f32.mrb[5].mxu0  ;;  %v3286_v3 = vand.u32 4294901760, %v6553_v14 }
 0x121   :  { %3268 = vmatprep.mubr.f32.mxu0 %v3267_v30 }
 0x122   :  { %v3287_v20 = vsub.f32 %v6553_v14, %v3286_v3 }
 0x123   :  { %v478_v62 = vpop.f32.mrb[6].mxu0 }
 0x124   :  { %3179 = vmatmul.mubr.f32.vlgmr.msra.gmra.mrb[56].mxu1 %v6341_v32  ;;  %v479_v54 = vadd.f32 %v478_v62, %v380_v63  ;;  %v480_v33 = vpop.f32.mrb[7].mxu0  ;;  %v3281_v32 = vsub.f32 %v6548_v60, %v3280_v36  ;;  %v3288_v28 = vand.u32 4294901760, %v3287_v20  ;;  %v3797_v62 = vand.u32 4294901760, %v91_v25 }
 0x125   :  { %5401 = vmatpush1.bf16.xpose.msra.mxu0 %v6555_v4  ;;  %5405 = vmatpush1.bf16.xpose.msra.mxu1 %v5404_v46  ;;  %v59_v33 = vld [vmem:[#allocation2 + $0x68] sm:$0xff] }
 0x126   :  { %3184 = vmatprep.mubr.f32.mxu1 %v6362_v59  ;;  %5407 = vmatprep.subr.bf16.mxu1 %v5406_v12  ;;  %v5412_v59 = vpack.c.bf16 %v6466_v45, %v6459_v55  ;;  %v3282_v27 = vand.u32 4294901760, %v3281_v32  ;;  %v6612_v24 = vsub.f32 %v91_v25, %v3797_v62  ;;  %v6614_v55 = vsub.f32 %v107_v16, %v3801_v40  ;;  %v6616_v45 = vld [vmem:[#allocation5 + $0x168] sm:$0xff] }
 0x127   :  { %v562_v21 = vpop.f32.mrb[4].mxu1  ;;  %5411 = vmatprep.subr.bf16.mxu0 %v5410_v15  ;;  %v75_v25 = vld [vmem:[#allocation2 + $0xe8] sm:$0xff] }
 0x128   :  { %v563_v34 = vadd.f32 %v562_v21, %v470_v48  ;;  %v564_v5 = vpop.f32.mrb[5].mxu1  ;;  %3186 = vmatmul.mubr.f32.gmra.mrb[58].mxu1 %v6368_v47  ;;  %v5426_v48 = vpack.c.bf16 %v3308_v7, %v3296_v35  ;;  %v5428_v35 = vpack.c.bf16 %v3314_v41, %v3302_v29  ;;  %v6604_v7 = vld [vmem:[#allocation5 + $0x60] sm:$0xff]  ;;  %v6618_v29 = vld [vmem:[#allocation5 + $0x1e8] sm:$0xff]  ;;  %v3902_v21 = vand.u32 4294901760, %v6612_v24 }
 0x129   :  { %3399 = vmatprep.mubr.f32.mxu1 %v6450_v8  ;;  %v3799_v50 = vand.u32 4294901760, %v6604_v7 }
 0x12b   :  { %v573_v63 = vpop.f32.mrb[6].mxu1  ;;  %v6634_v20 = vsub.f32 %v6604_v7, %v3799_v50  ;;  %v6709_v7 = vand.u32 4294901760, %v75_v25 }
 0x12c   :  { %v574_v44 = vadd.f32 %v573_v63, %v479_v54  ;;  %3274 = vmatmul.mubr.f32.vlgmr.msra.gmra.mrb[60].mxu0 %v3273_v58  ;;  %v575_v47 = vpop.f32.mrb[7].mxu1  ;;  %v5430_v54 = vpack.c.bf16 %v3332_v0, %v3320_v43  ;;  %v3805_v43 = vand.u32 4294901760, %v6616_v45  ;;  %v3809_v0 = vand.u32 4294901760, %v6618_v29  ;;  %v6653_v63 = vld [vmem:[#allocation5 + $0x160] sm:$0xff] }
 0x12d   :  { %5409 = vmatpush1.bf16.xpose.msra.mxu1 %v5408_v11  ;;  %5413 = vmatpush1.bf16.xpose.msra.mxu0 %v5412_v59  ;;  %v5432_v11 = vpack.c.bf16 %v3338_v37, %v3326_v26  ;;  %v6657_v26 = vpack.c.bf16 %v3801_v40, %v3797_v62  ;;  %v3903_v37 = vsub.f32 %v6612_v24, %v3902_v21 }
 0x12e   :  { %3283 = vmatprep.mubr.f32.mxu0 %v3282_v27  ;;  %5415 = vmatprep.subr.bf16.mxu0 %v5414_v42  ;;  %v6648_v27 = vsub.f32 %v6616_v45, %v3805_v43  ;;  %v6651_v42 = vsub.f32 %v6618_v29, %v3809_v0  ;;  %v6681_v62 = vpack.c.bf16 %v3803_v56, %v3799_v50 }
 0x12f   :  { %v669_v17 = vpop.f32.mrb[8].mxu0  ;;  %5419 = vmatprep.subr.bf16.mxu1 %v6481_v6 }
 0x130   :  { %v670_v30 = vadd.f32 %v669_v17, %v563_v34  ;;  %3289 = vmatmul.mubr.f32.gmra.mrb[62].mxu0 %v3288_v28  ;;  %v671_v2 = vpop.f32.mrb[9].mxu0  ;;  %v3914_v34 = vand.u32 4294901760, %v6614_v55  ;;  %v3908_v17 = vand.u32 4294901760, %v6634_v20 }
 0x131   :  { %3495 = vmatprep.mubr.f32.mxu0 %v6469_v52  ;;  %v3811_v2 = vand.u32 4294901760, %v6655_v18 }
 0x133   :  { %v676_v38 = vpop.f32.mrb[10].mxu0  ;;  %v6693_v40 = vsub.f32 %v6655_v18, %v3811_v2 }
 0x134   :  { %v677_v10 = vadd.f32 %v676_v38, %v574_v44  ;;  %3401 = vmatmul.mubr.f32.vlgmr.msra.gmra.mrb[60].mxu1 %v6510_v57  ;;  %v678_v46 = vpop.f32.mrb[11].mxu0  ;;  %v3915_v44 = vsub.f32 %v6614_v55, %v3914_v34 }
 0x135   :  { %5417 = vmatpush1.bf16.xpose.msra.mxu0 %v5416_v49  ;;  %5421 = vmatpush1.bf16.xpose.msra.mxu1 %v6503_v1 }
 0x136   :  { %3406 = vmatprep.mubr.f32.mxu1 %v6533_v31  ;;  %5423 = vmatprep.subr.bf16.mxu1 %v6525_v22  ;;  %v3916_v46 = vand.u32 4294901760, %v3915_v44 }
 0x137   :  { %v756_v12 = vpop.f32.mrb[8].mxu1  ;;  %5427 = vmatprep.subr.bf16.mxu0 %v5426_v48  ;;  %v58_v48 = vld [vmem:[#allocation2 + $0x60] sm:$0xff] }
 0x138   :  { %v757_v15 = vadd.f32 %v756_v12, %v670_v30  ;;  %v758_v19 = vpop.f32.mrb[9].mxu1  ;;  %3408 = vmatmul.mubr.f32.gmra.mrb[62].mxu1 %v6539_v39  ;;  %v3807_v30 = vand.u32 4294901760, %v6653_v63 }
 0x139   :  { %3587 = vmatprep.mubr.f32.mxu1 %v3265_v23  ;;  %v6624_v23 = vand.u32 4294901760, %v59_v33  ;;  %v6701_v19 = vpack.c.bf16 %v3809_v0, %v3805_v43  ;;  %v3944_v43 = vand.u32 4294901760, %v6693_v40 }
 0x13b   :  { %v763_v61 = vpop.f32.mrb[10].mxu1  ;;  %v6645_v59 = vsub.f32 %v59_v33, %v6624_v23 }
 0x13c   :  { %v764_v52 = vadd.f32 %v763_v61, %v677_v10  ;;  %3498 = vmatmul.mubr.f32.vlgmr.msra.gmra.mrb[64].mxu0 %v6537_v13  ;;  %v765_v41 = vpop.f32.mrb[11].mxu1  ;;  %v3926_v13 = vand.u32 4294901760, %v6648_v27 }
 0x13d   :  { %5425 = vmatpush1.bf16.xpose.msra.mxu1 %v6555_v4  ;;  %5429 = vmatpush1.bf16.xpose.msra.mxu0 %v5428_v35  ;;  %v3871_v38 = vand.u32 4294901760, %v6645_v59 }
 0x13e   :  { %3504 = vmatprep.mubr.f32.mxu0 %v6548_v60  ;;  %5431 = vmatprep.subr.bf16.mxu0 %v5430_v54  ;;  %v6686_v60 = vand.u32 4294901760, %v58_v48 }
 0x13f   :  { %v851_v32 = vpop.f32.mrb[12].mxu0  ;;  %5435 = vmatprep.subr.bf16.mxu1 %v6481_v6  ;;  %v6642_v6 = vsub.f32 %v6610_v53, %v3803_v56 }
 0x140   :  { %v852_v5 = vadd.f32 %v851_v32, %v757_v15  ;;  %3507 = vmatmul.mubr.f32.gmra.mrb[66].mxu0 %v6553_v14  ;;  %v853_v58 = vpop.f32.mrb[13].mxu0  ;;  %v74_v15 = vld [vmem:[#allocation2 + $0xe0] sm:$0xff]  ;;  %v6713_v29 = vsub.f32 %v58_v48, %v6686_v60 }
 0x141   :  { %3696 = vmatprep.mubr.f32.mxu0 %v6450_v8  ;;  %v3920_v49 = vand.u32 4294901760, %v6642_v6 }
 0x143   :  { %v866_v9 = vpop.f32.mrb[14].mxu0  ;;  %v3921_v14 = vsub.f32 %v6642_v6, %v3920_v49 }
 0x144   :  { %v867_v28 = vadd.f32 %v866_v9, %v764_v52  ;;  %3591 = vmatmul.mubr.f32.vlgmr.msra.gmra.mrb[64].mxu1 %v3271_v51  ;;  %v868_v47 = vpop.f32.mrb[15].mxu0  ;;  %v3938_v51 = vand.u32 4294901760, %v6651_v42  ;;  %v6715_v52 = vand.u32 4294901760, %v74_v15  ;;  %v6731_v9 = vpack.c.bf16 %v3811_v2, %v3807_v30 }
 0x145   :  { %5433 = vmatpush1.bf16.xpose.msra.mxu0 %v5432_v11  ;;  %5437 = vmatpush1.bf16.xpose.msra.mxu1 %v6503_v1  ;;  %v3904_v1 = vand.u32 4294901760, %v3903_v37  ;;  %v3922_v41 = vand.u32 4294901760, %v3921_v14 }
 0x146   :  { %3598 = vmatprep.mubr.f32.mxu1 %v3280_v36  ;;  %5439 = vmatprep.subr.bf16.mxu1 %v6525_v22  ;;  %v3909_v22 = vsub.f32 %v6634_v20, %v3908_v17  ;;  %v6690_v36 = vsub.f32 %v6653_v63, %v3807_v30  ;;  %v3939_v35 = vsub.f32 %v6651_v42, %v3938_v51  ;;  %v3877_v63 = vand.u32 4294901760, %v6713_v29 }
 0x147   :  { %v978_v10 = vpop.f32.mrb[12].mxu1  ;;  %5443 = vmatprep.subr.bf16.mxu0 %v6657_v26  ;;  %v5450_v53 = vpack.c.bf16 %v3916_v46, %v3904_v1  ;;  %v6729_v18 = vsub.f32 %v74_v15, %v6715_v52  ;;  %v5458_v1 = vpack.c.bf16 %v6614_v55, %v6612_v24 }
 0x148   :  { %v979_v16 = vadd.f32 %v978_v10, %v852_v5  ;;  %v980_v12 = vpop.f32.mrb[13].mxu1  ;;  %3602 = vmatmul.mubr.f32.gmra.mrb[66].mxu1 %v3286_v3  ;;  %v3872_v3 = vsub.f32 %v6645_v59, %v3871_v38  ;;  %v3910_v45 = vand.u32 4294901760, %v3909_v22  ;;  %v3932_v56 = vand.u32 4294901760, %v6690_v36 }
 0x149   :  { %3783 = vmatprep.mubr.f32.mxu1 %v6450_v8  ;;  %v3927_v8 = vsub.f32 %v6648_v27, %v3926_v13  ;;  %v3940_v32 = vand.u32 4294901760, %v3939_v35  ;;  %v6724_v5 = vsub.f32 %v75_v25, %v6709_v7  ;;  %v3878_v30 = vsub.f32 %v6713_v29, %v3877_v63 }
 0x14a   :  { %v3873_v50 = vand.u32 4294901760, %v3872_v3  ;;  %v5452_v37 = vpack.c.bf16 %v3922_v41, %v3910_v45  ;;  %v3933_v44 = vsub.f32 %v6690_v36, %v3932_v56  ;;  %v3892_v25 = vand.u32 4294901760, %v6729_v18 }
 0x14b   :  { %v985_v54 = vpop.f32.mrb[14].mxu1  ;;  %v3928_v0 = vand.u32 4294901760, %v3927_v8  ;;  %v3886_v48 = vand.u32 4294901760, %v6724_v5  ;;  %v3879_v15 = vand.u32 4294901760, %v3878_v30  ;;  %v5478_v30 = vpack.c.bf16 %v3938_v51, %v3926_v13 }
 0x14c   :  { %v986_v33 = vadd.f32 %v985_v54, %v867_v28  ;;  %3698 = vmatmul.mubr.f32.vlgmr.msra.gmra.mrb[68].mxu0 %v6510_v57  ;;  %v987_v61 = vpop.f32.mrb[15].mxu1  ;;  %v3945_v28 = vsub.f32 %v6693_v40, %v3944_v43  ;;  %v3893_v8 = vsub.f32 %v6729_v18, %v3892_v25 }
 0x14d   :  { %5441 = vmatpush1.bf16.xpose.msra.mxu1 %v6555_v4  ;;  %5445 = vmatpush1.bf16.xpose.msra.mxu0 %v6681_v62  ;;  %v5454_v47 = vpack.c.bf16 %v3940_v32, %v3928_v0  ;;  %v3887_v22 = vsub.f32 %v6724_v5, %v3886_v48  ;;  %v5464_v32 = vpack.c.bf16 %v6693_v40, %v6690_v36 }
 0x14e   :  { %3703 = vmatprep.mubr.f32.mxu0 %v6533_v31  ;;  %5447 = vmatprep.subr.bf16.mxu0 %v6701_v19  ;;  %v3946_v12 = vand.u32 4294901760, %v3945_v28  ;;  %v3894_v45 = vand.u32 4294901760, %v3893_v8  ;;  %v109_v28 = vld [vmem:[#allocation5 + $0xf8] sm:$0xff] }
 0x14f   :  { %v1075_v58 = vpop.f32.mrb[16].mxu0  ;;  %5451 = vmatprep.subr.bf16.mxu1 %v5450_v53  ;;  %v3888_v54 = vand.u32 4294901760, %v3887_v22  ;;  %v5462_v53 = vpack.c.bf16 %v6651_v42, %v6648_v27  ;;  %v4407_v24 = vand.u32 4294901760, %v109_v28 }
 0x150   :  { %v1076_v4 = vadd.f32 %v1075_v58, %v979_v16  ;;  %3705 = vmatmul.mubr.f32.gmra.mrb[70].mxu0 %v6539_v39  ;;  %v1077_v11 = vpop.f32.mrb[17].mxu0  ;;  %v3934_v16 = vand.u32 4294901760, %v3933_v44  ;;  %v93_v44 = vld [vmem:[#allocation5 + $0x78] sm:$0xff] }
 0x151   :  { %3874 = vmatprep.mubr.f32.mxu0 %v3873_v50  ;;  %v6790_v22 = vsub.f32 %v109_v28, %v4407_v24  ;;  %v77_v28 = vld [vmem:[#allocation2 + $0xf8] sm:$0xff] }
 0x152   :  { %v5456_v35 = vpack.c.bf16 %v3946_v12, %v3934_v16 }
 0x153   :  { %v1084_v10 = vpop.f32.mrb[18].mxu0 }
 0x154   :  { %v1085_v46 = vadd.f32 %v1084_v10, %v986_v33  ;;  %3785 = vmatmul.mubr.f32.vlgmr.msra.gmra.mrb[68].mxu1 %v6510_v57  ;;  %v1086_v2 = vpop.f32.mrb[19].mxu0  ;;  %v4403_v10 = vand.u32 4294901760, %v93_v44 }
 0x155   :  { %5449 = vmatpush1.bf16.xpose.msra.mxu0 %v6731_v9  ;;  %5453 = vmatpush1.bf16.xpose.msra.mxu1 %v5452_v37  ;;  %v61_v2 = vld [vmem:[#allocation2 + $0x78] sm:$0xff] }
 0x156   :  { %3790 = vmatprep.mubr.f32.mxu1 %v6533_v31  ;;  %5455 = vmatprep.subr.bf16.mxu1 %v5454_v47  ;;  %v5460_v31 = vpack.c.bf16 %v6642_v6, %v6634_v20  ;;  %v6788_v12 = vsub.f32 %v93_v44, %v4403_v10  ;;  %v6793_v6 = vld [vmem:[#allocation5 + $0x178] sm:$0xff]  ;;  %v6800_v42 = vand.u32 4294901760, %v61_v2  ;;  %v6835_v36 = vpack.c.bf16 %v4407_v24, %v4403_v10  ;;  %v6870_v24 = vld [vmem:[%s7050_s1] sm:$0xff] }
 0x157   :  { %v1168_v57 = vpop.f32.mrb[16].mxu1  ;;  %5459 = vmatprep.subr.bf16.mxu0 %v5458_v1 }
 0x158   :  { %v1169_v14 = vadd.f32 %v1168_v57, %v1076_v4  ;;  %v1170_v3 = vpop.f32.mrb[17].mxu1  ;;  %3792 = vmatmul.mubr.f32.gmra.mrb[70].mxu1 %v6539_v39  ;;  %v5474_v4 = vpack.c.bf16 %v3914_v34, %v3902_v21  ;;  %v6774_v21 = vld [vmem:[#allocation5 + $0x70] sm:$0xff]  ;;  %v5476_v34 = vpack.c.bf16 %v3920_v49, %v3908_v17  ;;  %v6795_v17 = vld [vmem:[#allocation5 + $0x1f8] sm:$0xff] }
 0x159   :  { %4005 = vmatprep.mubr.f32.mxu1 %v6624_v23  ;;  %v4405_v20 = vand.u32 4294901760, %v6774_v21  ;;  %v4415_v13 = vand.u32 4294901760, %v6795_v17  ;;  %v4520_v3 = vand.u32 4294901760, %v6790_v22 }
 0x15b   :  { %v1179_v33 = vpop.f32.mrb[18].mxu1  ;;  %v6809_v57 = vsub.f32 %v6774_v21, %v4405_v20 }
 0x15c   :  { %v1180_v61 = vadd.f32 %v1179_v33, %v1085_v46  ;;  %3880 = vmatmul.mubr.f32.vlgmr.msra.gmra.mrb[72].mxu0 %v3879_v15  ;;  %v1181_v39 = vpop.f32.mrb[19].mxu1  ;;  %v6782_v46 = vld [vmem:[#allocation5 + $0xf0] sm:$0xff] }
 0x15d   :  { %5457 = vmatpush1.bf16.xpose.msra.mxu1 %v5456_v35  ;;  %5461 = vmatpush1.bf16.xpose.msra.mxu0 %v5460_v31  ;;  %v4409_v27 = vand.u32 4294901760, %v6782_v46  ;;  %v6823_v31 = vsub.f32 %v61_v2, %v6800_v42  ;;  %v6831_v33 = vld [vmem:[#allocation5 + $0x170] sm:$0xff] }
 0x15e   :  { %3889 = vmatprep.mubr.f32.mxu0 %v3888_v54  ;;  %5463 = vmatprep.subr.bf16.mxu0 %v5462_v53  ;;  %v6829_v53 = vsub.f32 %v6795_v17, %v4415_v13 }
 0x15f   :  { %v1275_v41 = vpop.f32.mrb[20].mxu0  ;;  %5467 = vmatprep.subr.bf16.mxu1 %v6657_v26  ;;  %v6815_v35 = vsub.f32 %v6782_v46, %v4409_v27 }
 0x160   :  { %v1276_v50 = vadd.f32 %v1275_v41, %v1169_v14  ;;  %3895 = vmatmul.mubr.f32.gmra.mrb[74].mxu0 %v3894_v45  ;;  %v1277_v0 = vpop.f32.mrb[21].mxu0  ;;  %v4508_v14 = vand.u32 4294901760, %v6788_v12 }
 0x161   :  { %4101 = vmatprep.mubr.f32.mxu0 %v6645_v59  ;;  %v4413_v0 = vand.u32 4294901760, %v6831_v33 }
 0x162   :  { %v4509_v40 = vsub.f32 %v6788_v12, %v4508_v14 }
 0x163   :  { %v1282_v58 = vpop.f32.mrb[22].mxu0 }
 0x164   :  { %v1283_v11 = vadd.f32 %v1282_v58, %v1180_v61  ;;  %4007 = vmatmul.mubr.f32.vlgmr.msra.gmra.mrb[72].mxu1 %v6686_v60  ;;  %v1284_v37 = vpop.f32.mrb[23].mxu0  ;;  %v6833_v61 = vld [vmem:[#allocation5 + $0x1f0] sm:$0xff]  ;;  %v4477_v58 = vand.u32 4294901760, %v6823_v31 }
 0x165   :  { %5465 = vmatpush1.bf16.xpose.msra.mxu0 %v5464_v32  ;;  %5469 = vmatpush1.bf16.xpose.msra.mxu1 %v6681_v62  ;;  %v4417_v32 = vand.u32 4294901760, %v6833_v61 }
 0x166   :  { %4012 = vmatprep.mubr.f32.mxu1 %v6709_v7  ;;  %5471 = vmatprep.subr.bf16.mxu1 %v6701_v19 }
 0x167   :  { %v1362_v47 = vpop.f32.mrb[20].mxu1  ;;  %5475 = vmatprep.subr.bf16.mxu0 %v5474_v4  ;;  %v60_v4 = vld [vmem:[#allocation2 + $0x70] sm:$0xff] }
 0x168   :  { %v1363_v1 = vadd.f32 %v1362_v47, %v1276_v50  ;;  %v1364_v55 = vpop.f32.mrb[21].mxu1  ;;  %4014 = vmatmul.mubr.f32.gmra.mrb[74].mxu1 %v6715_v52  ;;  %v4526_v50 = vand.u32 4294901760, %v6815_v35  ;;  %v5640_v47 = vmov 1   ;;  %v6865_v10 = vand.u32 4294901760, %v60_v4 }
 0x169   :  { %4193 = vmatprep.mubr.f32.mxu1 %v3871_v38  ;;  %v4411_v38 = vand.u32 4294901760, %v6793_v6  ;;  %5550 = vset.pattern.permute.xlu1 %v5640_v47  ;;  %v4478_v55 = vsub.f32 %v6823_v31, %v4477_v58 }
 0x16a   :  { %5011 = vperm.xlu1 %5550, %v6870_v24  }
 0x16b   :  { %v1369_v16 = vpop.f32.mrb[22].mxu1  ;;  %v6826_v54 = vsub.f32 %v6793_v6, %v4411_v38  ;;  %v6887_v46 = vpack.c.bf16 %v4415_v13, %v4411_v38  ;;  %v6906_v38 = vld [vmem:[%s7050_s1 + $0x8] sm:$0xff]  ;;  %v4479_v13 = vand.u32 4294901760, %v4478_v55 }
 0x16c   :  { %v1370_v59 = vadd.f32 %v1369_v16, %v1283_v11  ;;  %4104 = vmatmul.mubr.f32.vlgmr.msra.gmra.mrb[76].mxu0 %v6713_v29  ;;  %v1371_v49 = vpop.f32.mrb[23].mxu1 }
 0x16d   :  { %5473 = vmatpush1.bf16.xpose.msra.mxu1 %v6731_v9  ;;  %5477 = vmatpush1.bf16.xpose.msra.mxu0 %v5476_v34  ;;  %v4532_v29 = vand.u32 4294901760, %v6826_v54  ;;  %v76_v34 = vld [vmem:[#allocation2 + $0xf0] sm:$0xff]  ;;  %v6899_v49 = vsub.f32 %v60_v4, %v6865_v10 }
 0x16e   :  { %4110 = vmatprep.mubr.f32.mxu0 %v6724_v5  ;;  %5479 = vmatprep.subr.bf16.mxu0 %v5478_v30  ;;  %v6895_v30 = vand.u32 4294901760, %v77_v28 }
 0x16f   :  { %v1457_v51 = vpop.f32.mrb[24].mxu0  ;;  %5483 = vmatprep.subr.bf16.mxu1 %v6657_v26  ;;  %v5480_v26 = vpack.c.bf16 %v3944_v43, %v3932_v56  ;;  %v4521_v56 = vsub.f32 %v6790_v22, %v4520_v3  ;;  %v4514_v43 = vand.u32 4294901760, %v6809_v57  ;;  %v4533_v21 = vsub.f32 %v6826_v54, %v4532_v29  ;;  %5015 = vperm.xlu1 %5550, %v6906_v38  }
 0x170   :  { %v1458_v15 = vadd.f32 %v1457_v51, %v1363_v1  ;;  %4113 = vmatmul.mubr.f32.gmra.mrb[78].mxu0 %v6729_v18  ;;  %v1459_v8 = vpop.f32.mrb[25].mxu0  ;;  %v6875_v1 = vpack.c.bf16 %v4409_v27, %v4405_v20  ;;  %v6879_v18 = vsub.f32 %v6831_v33, %v4413_v0  ;;  %v6901_v27 = vand.u32 4294901760, %v76_v34 }
 0x171   :  { %4302 = vmatprep.mubr.f32.mxu0 %v6624_v23  ;;  %v4522_v37 = vand.u32 4294901760, %v4521_v56  ;;  %v4515_v44 = vsub.f32 %v6809_v57, %v4514_v43  ;;  %v4534_v8 = vand.u32 4294901760, %v4533_v21  ;;  %v6916_v33 = vsub.f32 %v77_v28, %v6895_v30 }
 0x172   :  { %v4538_v51 = vand.u32 4294901760, %v6879_v18  ;;  %v6919_v56 = vpack.c.bf16 %v4417_v32, %v4413_v0  ;;  %v5642_v21 = vmov 3  }
 0x173   :  { %v1472_v45 = vpop.f32.mrb[26].mxu0  ;;  %v4516_v20 = vand.u32 4294901760, %v4515_v44  ;;  %v5506_v44 = vpack.c.bf16 %v6790_v22, %v6788_v12  ;;  %v5524_v22 = vpack.c.bf16 %v4526_v50, %v4514_v43 }
 0x174   :  { %v1473_v39 = vadd.f32 %v1472_v45, %v1370_v59  ;;  %4197 = vmatmul.mubr.f32.vlgmr.msra.gmra.mrb[76].mxu1 %v3877_v63  ;;  %v1474_v41 = vpop.f32.mrb[27].mxu0  ;;  %v4544_v63 = vand.u32 4294901760, %v6829_v53  ;;  %v5641_v45 = vmov 2  }
 0x175   :  { %5481 = vmatpush1.bf16.xpose.msra.mxu0 %v5480_v26  ;;  %5485 = vmatpush1.bf16.xpose.msra.mxu1 %v6681_v62  ;;  %v4510_v62 = vand.u32 4294901760, %v4509_v40  ;;  %v6923_v41 = vsub.f32 %v76_v34, %v6901_v27 }
 0x176   :  { %4204 = vmatprep.mubr.f32.mxu1 %v3886_v48  ;;  %5487 = vmatprep.subr.bf16.mxu1 %v6701_v19  ;;  %v4527_v19 = vsub.f32 %v6815_v35, %v4526_v50 }
 0x177   :  { %v1584_v11 = vpop.f32.mrb[24].mxu1  ;;  %5491 = vmatprep.subr.bf16.mxu0 %v6835_v36  ;;  %v5498_v16 = vpack.c.bf16 %v4522_v37, %v4510_v62  ;;  %5551 = vset.pattern.permute.xlu0 %v5641_v45 }
 0x178   :  { %v1585_v5 = vadd.f32 %v1584_v11, %v1458_v15  ;;  %v1586_v48 = vpop.f32.mrb[25].mxu1  ;;  %4208 = vmatmul.mubr.f32.gmra.mrb[78].mxu1 %v3892_v25  ;;  %v6882_v25 = vsub.f32 %v6833_v61, %v4417_v32  ;;  %v4528_v59 = vand.u32 4294901760, %v4527_v19  ;;  %5552 = vset.pattern.permute.xlu1 %v5641_v45  ;;  %v4539_v11 = vsub.f32 %v6879_v18, %v4538_v51 }
 0x179   :  { %4389 = vmatprep.mubr.f32.mxu1 %v6624_v23  ;;  %v4545_v23 = vsub.f32 %v6829_v53, %v4544_v63  ;;  %5032 = vperm.xlu1 %5552, %v6906_v38   ;;  %v4492_v32 = vand.u32 4294901760, %v6916_v33  ;;  %v4498_v48 = vand.u32 4294901760, %v6923_v41 }
 0x17a   :  { %v4550_v15 = vand.u32 4294901760, %v6882_v25  ;;  %v5500_v4 = vpack.c.bf16 %v4528_v59, %v4516_v20  ;;  %5028 = vperm.xlu0 %5551, %v6870_v24   ;;  %v4540_v19 = vand.u32 4294901760, %v4539_v11  ;;  %v5510_v59 = vpack.c.bf16 %v6829_v53, %v6826_v54 }
 0x17b   :  { %v1591_v2 = vpop.f32.mrb[26].mxu1  ;;  %v4546_v26 = vand.u32 4294901760, %v4545_v23  ;;  %v4493_v34 = vsub.f32 %v6916_v33, %v4492_v32  ;;  %v4499_v20 = vsub.f32 %v6923_v41, %v4498_v48 }
 0x17c   :  { %v1592_v6 = vadd.f32 %v1591_v2, %v1473_v39  ;;  %4304 = vmatmul.mubr.f32.vlgmr.msra.gmra.mrb[80].mxu0 %v6686_v60  ;;  %v1593_v17 = vpop.f32.mrb[27].mxu1  ;;  %v4483_v39 = vand.u32 4294901760, %v6899_v49  ;;  %v4551_v62 = vsub.f32 %v6882_v25, %v4550_v15  ;;  %v5528_v54 = vpack.c.bf16 %v4550_v15, %v4538_v51 }
 0x17d   :  { %5489 = vmatpush1.bf16.xpose.msra.mxu1 %v6731_v9  ;;  %5493 = vmatpush1.bf16.xpose.msra.mxu0 %v6875_v1  ;;  %v5502_v0 = vpack.c.bf16 %v4546_v26, %v4534_v8  ;;  %v4494_v17 = vand.u32 4294901760, %v4493_v34  ;;  %v4500_v8 = vand.u32 4294901760, %v4499_v20 }
 0x17e   :  { %4309 = vmatprep.mubr.f32.mxu0 %v6709_v7  ;;  %5495 = vmatprep.subr.bf16.mxu0 %v6887_v46  ;;  %v4484_v47 = vsub.f32 %v6899_v49, %v4483_v39  ;;  %v4552_v55 = vand.u32 4294901760, %v4551_v62  ;;  %v5522_v62 = vpack.c.bf16 %v4520_v3, %v4508_v14  ;;  %v5526_v14 = vpack.c.bf16 %v4544_v63, %v4532_v29 }
 0x17f   :  { %v1681_v61 = vpop.f32.mrb[28].mxu0  ;;  %5499 = vmatprep.subr.bf16.mxu1 %v5498_v16  ;;  %5553 = vset.pattern.permute.xlu1 %v5642_v21 }
 0x180   :  { %v1682_v9 = vadd.f32 %v1681_v61, %v1585_v5  ;;  %4311 = vmatmul.mubr.f32.gmra.mrb[82].mxu0 %v6715_v52  ;;  %v1683_v40 = vpop.f32.mrb[29].mxu0  ;;  %v4485_v16 = vand.u32 4294901760, %v4484_v47  ;;  %5045 = vperm.xlu1 %5553, %v6870_v24   ;;  %v5643_v61 = vmov 4  }
 0x181   :  { %4480 = vmatprep.mubr.f32.mxu0 %v4479_v13  ;;  %5554 = vset.pattern.permute.xlu0 %v5642_v21 }
 0x182   :  { %5049 = vperm.xlu0 %5554, %v6906_v38  }
 0x183   :  { %v1690_v37 = vpop.f32.mrb[30].mxu0 }
 0x184   :  { %v1691_v28 = vadd.f32 %v1690_v37, %v1592_v6  ;;  %4391 = vmatmul.mubr.f32.vlgmr.msra.gmra.mrb[80].mxu1 %v6686_v60  ;;  %v1692_v5 = vpop.f32.mrb[31].mxu0  ;;  %v5508_v6 = vpack.c.bf16 %v6815_v35, %v6809_v57  ;;  %5555 = vset.pattern.permute.xlu1 %v5643_v61 }
 0x185   :  { %5497 = vmatpush1.bf16.xpose.msra.mxu0 %v6919_v56  ;;  %5501 = vmatpush1.bf16.xpose.msra.mxu1 %v5500_v4  ;;  %v5512_v4 = vpack.c.bf16 %v6882_v25, %v6879_v18 }
 0x186   :  { %4396 = vmatprep.mubr.f32.mxu1 %v6709_v7  ;;  %5503 = vmatprep.subr.bf16.mxu1 %v5502_v0  ;;  %v5504_v7 = vpack.c.bf16 %v4552_v55, %v4540_v19 }
 0x187   :  { %v1774_v60 = vpop.f32.mrb[28].mxu1  ;;  %5507 = vmatprep.subr.bf16.mxu0 %v5506_v44  ;;  %5062 = vperm.xlu1 %5555, %v6870_v24  }
 0x188   :  { %v1775_v23 = vadd.f32 %v1774_v60, %v1682_v9  ;;  %v1776_v2 = vpop.f32.mrb[29].mxu1  ;;  %4398 = vmatmul.mubr.f32.gmra.mrb[82].mxu1 %v6715_v52  ;;  %5556 = vset.pattern.permute.xlu0 %v5643_v61 }
 0x189   :  { %4611 = vmatprep.mubr.f32.mxu1 %v6800_v42 }
 0x18b   :  { %v1785_v52 = vpop.f32.mrb[30].mxu1  ;;  %5066 = vperm.xlu1 %5555, %v6906_v38  }
 0x18c   :  { %v1786_v13 = vadd.f32 %v1785_v52, %v1691_v28  ;;  %4486 = vmatmul.mubr.f32.vlgmr.msra.gmra.mrb[84].mxu0 %v4485_v16  ;;  %v1787_v26 = vpop.f32.mrb[31].mxu1 }
 0x18d   :  { %5505 = vmatpush1.bf16.xpose.msra.mxu1 %v5504_v7  ;;  %5509 = vmatpush1.bf16.xpose.msra.mxu0 %v5508_v6 }
 0x18e   :  { %4495 = vmatprep.mubr.f32.mxu0 %v4494_v17  ;;  %5511 = vmatprep.subr.bf16.mxu0 %v5510_v59 }
 0x18f   :  { %v1881_v45 = vpop.f32.mrb[32].mxu0  ;;  %5515 = vmatprep.subr.bf16.mxu1 %v6835_v36 }
 0x190   :  { %v1882_v9 = vadd.f32 %v1881_v45, %v1775_v23  ;;  %4501 = vmatmul.mubr.f32.gmra.mrb[86].mxu0 %v4500_v8  ;;  %v1883_v40 = vpop.f32.mrb[33].mxu0 }
 0x191   :  { %4707 = vmatprep.mubr.f32.mxu0 %v6823_v31 }
 0x193   :  { %v1888_v11 = vpop.f32.mrb[34].mxu0 }
 0x194   :  { %v1889_v0 = vadd.f32 %v1888_v11, %v1786_v13  ;;  %4613 = vmatmul.mubr.f32.vlgmr.msra.gmra.mrb[84].mxu1 %v6865_v10  ;;  %v1890_v24 = vpop.f32.mrb[35].mxu0 }
 0x195   :  { %5513 = vmatpush1.bf16.xpose.msra.mxu0 %v5512_v4  ;;  %5517 = vmatpush1.bf16.xpose.msra.mxu1 %v6875_v1 }
 0x196   :  { %4618 = vmatprep.mubr.f32.mxu1 %v6895_v30  ;;  %5519 = vmatprep.subr.bf16.mxu1 %v6887_v46 }
 0x197   :  { %v1968_v37 = vpop.f32.mrb[32].mxu1  ;;  %5523 = vmatprep.subr.bf16.mxu0 %v5522_v62 }
 0x198   :  { %v1969_v44 = vadd.f32 %v1968_v37, %v1882_v9  ;;  %v1970_v12 = vpop.f32.mrb[33].mxu1  ;;  %4620 = vmatmul.mubr.f32.gmra.mrb[86].mxu1 %v6901_v27 }
 0x199   :  { %4799 = vmatprep.mubr.f32.mxu1 %v4477_v58 }
 0x19b   :  { %v1975_v3 = vpop.f32.mrb[34].mxu1 }
 0x19c   :  { %v1976_v38 = vadd.f32 %v1975_v3, %v1889_v0  ;;  %4710 = vmatmul.mubr.f32.vlgmr.msra.gmra.mrb[88].mxu0 %v6899_v49  ;;  %v1977_v28 = vpop.f32.mrb[35].mxu1 }
 0x19d   :  { %5521 = vmatpush1.bf16.xpose.msra.mxu1 %v6919_v56  ;;  %5525 = vmatpush1.bf16.xpose.msra.mxu0 %v5524_v22 }
 0x19e   :  { %4716 = vmatprep.mubr.f32.mxu0 %v6916_v33  ;;  %5527 = vmatprep.subr.bf16.mxu0 %v5526_v14 }
 0x19f   :  { %v2063_v57 = vpop.f32.mrb[36].mxu0  ;;  %5531 = vmatprep.subr.bf16.mxu1 %v6835_v36 }
 0x1a0   :  { %v2064_v35 = vadd.f32 %v2063_v57, %v1969_v44  ;;  %4719 = vmatmul.mubr.f32.gmra.mrb[90].mxu0 %v6923_v41  ;;  %v2065_v31 = vpop.f32.mrb[37].mxu0 }
 0x1a1   :  { %4908 = vmatprep.mubr.f32.mxu0 %v6800_v42 }
 0x1a3   :  { %v2078_v53 = vpop.f32.mrb[38].mxu0 }
 0x1a4   :  { %v2079_v43 = vadd.f32 %v2078_v53, %v1976_v38  ;;  %4803 = vmatmul.mubr.f32.vlgmr.msra.gmra.mrb[88].mxu1 %v4483_v39  ;;  %v2080_v50 = vpop.f32.mrb[39].mxu0 }
 0x1a5   :  { %5529 = vmatpush1.bf16.xpose.msra.mxu0 %v5528_v54  ;;  %5533 = vmatpush1.bf16.xpose.msra.mxu1 %v6875_v1 }
 0x1a6   :  { %4810 = vmatprep.mubr.f32.mxu1 %v4492_v32  ;;  %5535 = vmatprep.subr.bf16.mxu1 %v6887_v46 }
 0x1a7   :  { %v2190_v36 = vpop.f32.mrb[36].mxu1 }
 0x1a8   :  { %v2191_v58 = vadd.f32 %v2190_v36, %v2064_v35  ;;  %v2192_v29 = vpop.f32.mrb[37].mxu1  ;;  %4814 = vmatmul.mubr.f32.gmra.mrb[90].mxu1 %v4498_v48 }
 0x1a9   :  { %4995 = vmatprep.mubr.f32.mxu1 %v6800_v42 }
 0x1ab   :  { %v2197_v63 = vpop.f32.mrb[38].mxu1 }
 0x1ac   :  { %v2198_v18 = vadd.f32 %v2197_v63, %v2079_v43  ;;  %4910 = vmatmul.mubr.f32.vlgmr.msra.gmra.mrb[92].mxu0 %v6865_v10  ;;  %v2199_v25 = vpop.f32.mrb[39].mxu1 }
 0x1ad   :  { %5537 = vmatpush1.bf16.xpose.msra.mxu1 %v6919_v56  ;;  %4915 = vmatprep.mubr.f32.mxu0 %v6895_v30 }
 0x1af   :  { %v2287_v1 = vpop.f32.mrb[40].mxu0 }
 0x1b0   :  { %v2288_v49 = vadd.f32 %v2287_v1, %v2191_v58  ;;  %4917 = vmatmul.mubr.f32.gmra.mrb[94].mxu0 %v6901_v27  ;;  %v2289_v46 = vpop.f32.mrb[41].mxu0 }
 0x1b3   :  { %v2296_v51 = vpop.f32.mrb[42].mxu0 }
 0x1b4   :  { %v2297_v15 = vadd.f32 %v2296_v51, %v2198_v18  ;;  %4997 = vmatmul.mubr.f32.vlgmr.msra.gmra.mrb[92].mxu1 %v6865_v10  ;;  %v2298_v33 = vpop.f32.mrb[43].mxu0 }
 0x1b5   :  { %5002 = vmatprep.mubr.f32.mxu1 %v6895_v30 }
 0x1b7   :  { %v2380_v42 = vpop.f32.mrb[40].mxu1 }
 0x1b8   :  { %v2381_v39 = vadd.f32 %v2380_v42, %v2288_v49  ;;  %v2382_v41 = vpop.f32.mrb[41].mxu1  ;;  %5004 = vmatmul.mubr.f32.gmra.mrb[94].mxu1 %v6901_v27 }
 0x1bb   :  { %v2391_v56 = vpop.f32.mrb[42].mxu1 }
 0x1bc   :  { %v2392_v32 = vadd.f32 %v2391_v56, %v2297_v15  ;;  %v2393_v47 = vpop.f32.mrb[43].mxu1 }
 0x1bf   :  { %v2487_v5 = vpop.f32.mrb[44].mxu0 }
 0x1c0   :  { %v2488_v48 = vadd.f32 %v2487_v5, %v2381_v39  ;;  %v2489_v19 = vpop.f32.mrb[45].mxu0 }
 0x1c3   :  { %v2494_v55 = vpop.f32.mrb[46].mxu0 }
 0x1c4   :  { %v2495_v34 = vadd.f32 %v2494_v55, %v2392_v32  ;;  %v2496_v60 = vpop.f32.mrb[47].mxu0 }
 0x1c7   :  { %v2574_v21 = vpop.f32.mrb[44].mxu1 }
 0x1c8   :  { %v2575_v23 = vadd.f32 %v2574_v21, %v2488_v48  ;;  %v2576_v10 = vpop.f32.mrb[45].mxu1 }
 0x1cb   :  { %v2581_v2 = vpop.f32.mrb[46].mxu1 }
 0x1cc   :  { %v2582_v16 = vadd.f32 %v2581_v2, %v2495_v34  ;;  %v2583_v30 = vpop.f32.mrb[47].mxu1 }
 0x1cf   :  { %v2669_v20 = vpop.f32.mrb[48].mxu0 }
 0x1d0   :  { %v2670_v7 = vadd.f32 %v2669_v20, %v2575_v23  ;;  %v2671_v6 = vpop.f32.mrb[49].mxu0 }
 0x1d3   :  { %v2684_v17 = vpop.f32.mrb[50].mxu0 }
 0x1d4   :  { %v2685_v27 = vadd.f32 %v2684_v17, %v2582_v16  ;;  %v2686_v59 = vpop.f32.mrb[51].mxu0 }
 0x1d7   :  { %v2796_v52 = vpop.f32.mrb[48].mxu1 }
 0x1d8   :  { %v2797_v13 = vadd.f32 %v2796_v52, %v2670_v7  ;;  %v2798_v8 = vpop.f32.mrb[49].mxu1 }
 0x1db   :  { %v2803_v26 = vpop.f32.mrb[50].mxu1 }
 0x1dc   :  { %v2804_v61 = vadd.f32 %v2803_v26, %v2685_v27  ;;  %v2805_v45 = vpop.f32.mrb[51].mxu1 }
 0x1df   :  { %v2893_v9 = vpop.f32.mrb[52].mxu0 }
 0x1e0   :  { %v2894_v40 = vadd.f32 %v2893_v9, %v2797_v13  ;;  %v2895_v4 = vpop.f32.mrb[53].mxu0 }
 0x1e3   :  { %v2902_v11 = vpop.f32.mrb[54].mxu0 }
 0x1e4   :  { %v2903_v62 = vadd.f32 %v2902_v11, %v2804_v61  ;;  %v2904_v0 = vpop.f32.mrb[55].mxu0 }
 0x1e7   :  { %v2986_v24 = vpop.f32.mrb[52].mxu1 }
 0x1e8   :  { %v2987_v37 = vadd.f32 %v2986_v24, %v2894_v40  ;;  %v2988_v44 = vpop.f32.mrb[53].mxu1 }
 0x1eb   :  { %v2997_v12 = vpop.f32.mrb[54].mxu1 }
 0x1ec   :  { %v2998_v22 = vadd.f32 %v2997_v12, %v2903_v62  ;;  %v2999_v14 = vpop.f32.mrb[55].mxu1 }
 0x1ef   :  { %v3093_v3 = vpop.f32.mrb[56].mxu0 }
 0x1f0   :  { %v3094_v38 = vadd.f32 %v3093_v3, %v2987_v37  ;;  %v3095_v28 = vpop.f32.mrb[57].mxu0 }
 0x1f3   :  { %v3100_v57 = vpop.f32.mrb[58].mxu0 }
 0x1f4   :  { %v3101_v35 = vadd.f32 %v3100_v57, %v2998_v22  ;;  %v3102_v31 = vpop.f32.mrb[59].mxu0 }
 0x1f7   :  { %v3180_v54 = vpop.f32.mrb[56].mxu1 }
 0x1f8   :  { %v3181_v53 = vadd.f32 %v3180_v54, %v3094_v38  ;;  %v3182_v43 = vpop.f32.mrb[57].mxu1 }
 0x1fb   :  { %v3187_v50 = vpop.f32.mrb[58].mxu1 }
 0x1fc   :  { %v3188_v36 = vadd.f32 %v3187_v50, %v3101_v35  ;;  %v3189_v58 = vpop.f32.mrb[59].mxu1 }
 0x1ff   :  { %v3275_v29 = vpop.f32.mrb[60].mxu0 }
 0x200   :  { %v3276_v63 = vadd.f32 %v3275_v29, %v3181_v53  ;;  %v3277_v18 = vpop.f32.mrb[61].mxu0 }
 0x203   :  { %v3290_v25 = vpop.f32.mrb[62].mxu0 }
 0x204   :  { %v3291_v1 = vadd.f32 %v3290_v25, %v3188_v36  ;;  %v3292_v49 = vpop.f32.mrb[63].mxu0 }
 0x207   :  { %v3402_v46 = vpop.f32.mrb[60].mxu1 }
 0x208   :  { %v3403_v51 = vadd.f32 %v3402_v46, %v3276_v63  ;;  %v3404_v15 = vpop.f32.mrb[61].mxu1 }
 0x20b   :  { %v3409_v33 = vpop.f32.mrb[62].mxu1 }
 0x20c   :  { %v3410_v42 = vadd.f32 %v3409_v33, %v3291_v1  ;;  %v3411_v39 = vpop.f32.mrb[63].mxu1 }
 0x20f   :  { %v3499_v41 = vpop.f32.mrb[64].mxu0 }
 0x210   :  { %v3500_v56 = vadd.f32 %v3499_v41, %v3403_v51  ;;  %v3501_v32 = vpop.f32.mrb[65].mxu0 }
 0x213   :  { %v3508_v47 = vpop.f32.mrb[66].mxu0 }
 0x214   :  { %v3509_v5 = vadd.f32 %v3508_v47, %v3410_v42  ;;  %v3510_v48 = vpop.f32.mrb[67].mxu0 }
 0x217   :  { %v3592_v19 = vpop.f32.mrb[64].mxu1 }
 0x218   :  { %v3593_v55 = vadd.f32 %v3592_v19, %v3500_v56  ;;  %v3594_v34 = vpop.f32.mrb[65].mxu1 }
 0x21b   :  { %v3603_v60 = vpop.f32.mrb[66].mxu1 }
 0x21c   :  { %v3604_v21 = vadd.f32 %v3603_v60, %v3509_v5  ;;  %v3605_v23 = vpop.f32.mrb[67].mxu1 }
 0x21f   :  { %v3699_v10 = vpop.f32.mrb[68].mxu0 }
 0x220   :  { %v3700_v2 = vadd.f32 %v3699_v10, %v3593_v55  ;;  %v3701_v16 = vpop.f32.mrb[69].mxu0  ;;  %v5012_v10 = vpop.permute.xlu1 %5011 }
 0x223   :  { %v3706_v30 = vpop.f32.mrb[70].mxu0 }
 0x224   :  { %v3707_v20 = vadd.f32 %v3706_v30, %v3604_v21  ;;  %v3708_v7 = vpop.f32.mrb[71].mxu0 }
 0x227   :  { %v3786_v6 = vpop.f32.mrb[68].mxu1 }
 0x228   :  { %v3787_v17 = vadd.f32 %v3786_v6, %v3700_v2  ;;  %v3788_v27 = vpop.f32.mrb[69].mxu1  ;;  %v5016_v6 = vpop.permute.xlu1 %5015 }
 0x22b   :  { %v3793_v59 = vpop.f32.mrb[70].mxu1 }
 0x22c   :  { %v3794_v52 = vadd.f32 %v3793_v59, %v3707_v20  ;;  %v3795_v13 = vpop.f32.mrb[71].mxu1 }
 0x22f   :  { %v3881_v8 = vpop.f32.mrb[72].mxu0 }
 0x230   :  { %v3882_v26 = vadd.f32 %v3881_v8, %v3787_v17  ;;  %v3883_v61 = vpop.f32.mrb[73].mxu0 }
 0x233   :  { %v3896_v45 = vpop.f32.mrb[74].mxu0 }
 0x234   :  { %v3897_v9 = vadd.f32 %v3896_v45, %v3794_v52  ;;  %v3898_v40 = vpop.f32.mrb[75].mxu0  ;;  %v5033_v52 = vpop.permute.xlu1 %5032 }
 0x237   :  { %v4008_v4 = vpop.f32.mrb[72].mxu1 }
 0x238   :  { %v4009_v11 = vadd.f32 %v4008_v4, %v3882_v26  ;;  %v4010_v62 = vpop.f32.mrb[73].mxu1  ;;  %v5046_v45 = vpop.permute.xlu1 %5045  ;;  %v5147_v4 = vld [vmem:[%s7052_s3 + $0x1] ss:$0 sm:$0xff] }
 0x239   :  { %v5148_v62 = vld [vmem:[%s7052_s3 + $0x2] ss:$0 sm:$0xff] }
 0x23b   :  { %v4015_v0 = vpop.f32.mrb[74].mxu1 }
 0x23c   :  { %v4016_v24 = vadd.f32 %v4015_v0, %v3897_v9  ;;  %v4017_v37 = vpop.f32.mrb[75].mxu1 }
 0x23f   :  { %v4105_v44 = vpop.f32.mrb[76].mxu0 }
 0x240   :  { %v4106_v12 = vadd.f32 %v4105_v44, %v4009_v11  ;;  %v4107_v22 = vpop.f32.mrb[77].mxu0  ;;  %v5029_v11 = vpop.permute.xlu0 %5028 }
 0x241   :  { %v5149_v22 = vld [vmem:[%s7052_s3 + $0x3] ss:$0 sm:$0xff] }
 0x243   :  { %v4114_v14 = vpop.f32.mrb[78].mxu0 }
 0x244   :  { %v4115_v3 = vadd.f32 %v4114_v14, %v4016_v24  ;;  %v4116_v38 = vpop.f32.mrb[79].mxu0  ;;  %v5022_v24 = vmul.f32 %v5147_v4, %v5012_v10  ;;  %v5150_v14 = vld [vmem:[%s7052_s3 + $0x4] ss:$0 sm:$0xff] }
 0x247   :  { %v4198_v28 = vpop.f32.mrb[76].mxu1 }
 0x248   :  { %v4199_v57 = vadd.f32 %v4198_v28, %v4106_v12  ;;  %v4200_v35 = vpop.f32.mrb[77].mxu1  ;;  %v5039_v12 = vmul.f32 %v5148_v62, %v5029_v11  ;;  %v5023_v28 = vmul.f32 %v5147_v4, %v5016_v6  ;;  %v5152_v6 = vld [vmem:[%s7052_s3 + $0x6] ss:$0 sm:$0xff] }
 0x249   :  { %v5050_v35 = vpop.permute.xlu0 %5049 }
 0x24b   :  { %v4209_v31 = vpop.f32.mrb[78].mxu1 }
 0x24c   :  { %v4210_v54 = vadd.f32 %v4209_v31, %v4115_v3  ;;  %v4211_v53 = vpop.f32.mrb[79].mxu1  ;;  %v5063_v3 = vpop.permute.xlu1 %5062  ;;  %v5056_v31 = vmul.f32 %v5149_v22, %v5046_v45 }
 0x24f   :  { %v4305_v43 = vpop.f32.mrb[80].mxu0 }
 0x250   :  { %v4306_v50 = vadd.f32 %v4305_v43, %v4199_v57  ;;  %v4307_v36 = vpop.f32.mrb[81].mxu0 }
 0x251   :  { %v5040_v36 = vmul.f32 %v5148_v62, %v5033_v52 }
 0x253   :  { %v4312_v58 = vpop.f32.mrb[82].mxu0 }
 0x254   :  { %v4313_v29 = vadd.f32 %v4312_v58, %v4210_v54  ;;  %v4314_v63 = vpop.f32.mrb[83].mxu0  ;;  %v5073_v54 = vmul.f32 %v5150_v14, %v5063_v3 }
 0x255   :  { %v5057_v63 = vmul.f32 %v5149_v22, %v5050_v35 }
 0x257   :  { %v4392_v18 = vpop.f32.mrb[80].mxu1 }
 0x258   :  { %v4393_v25 = vadd.f32 %v4392_v18, %v4306_v50  ;;  %v4394_v1 = vpop.f32.mrb[81].mxu1  ;;  %v5067_v18 = vpop.permute.xlu1 %5066 }
 0x25b   :  { %v4399_v49 = vpop.f32.mrb[82].mxu1 }
 0x25c   :  { %v4400_v46 = vadd.f32 %v4399_v49, %v4313_v29  ;;  %v4401_v51 = vpop.f32.mrb[83].mxu1 }
 0x25f   :  { %v4487_v15 = vpop.f32.mrb[84].mxu0 }
 0x260   :  { %v4488_v33 = vadd.f32 %v4487_v15, %v4393_v25  ;;  %v4489_v42 = vpop.f32.mrb[85].mxu0  ;;  %v5151_v25 = vld [vmem:[%s7052_s3 + $0x5] ss:$0 sm:$0xff] }
 0x263   :  { %v4502_v39 = vpop.f32.mrb[86].mxu0 }
 0x264   :  { %v4503_v41 = vadd.f32 %v4502_v39, %v4400_v46  ;;  %v4504_v56 = vpop.f32.mrb[87].mxu0  ;;  %v5074_v46 = vmul.f32 %v5150_v14, %v5067_v18 }
 0x267   :  { %v4614_v32 = vpop.f32.mrb[84].mxu1 }
 0x268   :  { %v4615_v47 = vadd.f32 %v4614_v32, %v4488_v33  ;;  %v4616_v5 = vpop.f32.mrb[85].mxu1 }
 0x26b   :  { %v4621_v48 = vpop.f32.mrb[86].mxu1 }
 0x26c   :  { %v4622_v19 = vadd.f32 %v4621_v48, %v4503_v41  ;;  %v4623_v55 = vpop.f32.mrb[87].mxu1 }
 0x26f   :  { %v4711_v34 = vpop.f32.mrb[88].mxu0 }
 0x270   :  { %v4712_v60 = vadd.f32 %v4711_v34, %v4615_v47  ;;  %v4713_v21 = vpop.f32.mrb[89].mxu0 }
 0x273   :  { %v4720_v23 = vpop.f32.mrb[90].mxu0 }
 0x274   :  { %v4721_v2 = vadd.f32 %v4720_v23, %v4622_v19  ;;  %v4722_v16 = vpop.f32.mrb[91].mxu0 }
 0x277   :  { %v4804_v30 = vpop.f32.mrb[88].mxu1 }
 0x278   :  { %v4805_v20 = vadd.f32 %v4804_v30, %v4712_v60  ;;  %v4806_v7 = vpop.f32.mrb[89].mxu1 }
 0x27b   :  { %v4815_v17 = vpop.f32.mrb[90].mxu1 }
 0x27c   :  { %v4816_v27 = vadd.f32 %v4815_v17, %v4721_v2  ;;  %v4817_v59 = vpop.f32.mrb[91].mxu1 }
 0x27f   :  { %v4911_v13 = vpop.f32.mrb[92].mxu0 }
 0x280   :  { %v4912_v8 = vadd.f32 %v4911_v13, %v4805_v20  ;;  %v4913_v26 = vpop.f32.mrb[93].mxu0 }
 0x283   :  { %v4918_v61 = vpop.f32.mrb[94].mxu0 }
 0x284   :  { %v4919_v9 = vadd.f32 %v4918_v61, %v4816_v27  ;;  %v4920_v40 = vpop.f32.mrb[95].mxu0  ;;  %v5153_v27 = vld [vmem:[%s7052_s3 + $0x7] ss:$0 sm:$0xff] }
 0x287   :  { %v4998_v0 = vpop.f32.mrb[92].mxu1 }
 0x288   :  { %v4999_v37 = vadd.f32 %v4998_v0, %v4912_v8  ;;  %v5000_v44 = vpop.f32.mrb[93].mxu1 }
 0x28a   :  { %v5024_v38 = vadd.f32 %v5022_v24, %v4999_v37 }
 0x28b   :  { %v5005_v57 = vpop.f32.mrb[94].mxu1 }
 0x28c   :  { %v5041_v53 = vadd.f32 %v5039_v12, %v5024_v38  ;;  %v5006_v43 = vadd.f32 %v5005_v57, %v4919_v9  ;;  %v5007_v50 = vpop.f32.mrb[95].mxu1 }
 0x28e   :  { %v5058_v58 = vadd.f32 %v5056_v31, %v5041_v53  ;;  %v5025_v29 = vadd.f32 %v5023_v28, %v5006_v43 }
 0x290   :  { %v5042_v1 = vadd.f32 %v5040_v36, %v5025_v29  ;;  %v5075_v49 = vadd.f32 %v5073_v54, %v5058_v58 }
 0x292   :  { %v5059_v51 = vadd.f32 %v5057_v63, %v5042_v1  ;;  %v5082_v15 = vadd.f32 %v5151_v25, %v5075_v49 }
 0x294   :  { %v5085_v33 = vsel %vm5084_vm0, %v5082_v15, 0.0  ;;  %v5076_v42 = vadd.f32 %v5074_v46, %v5059_v51 }
 0x295   :  { %5086 = vadd.xlane.f32.xlu0 %v5085_v33 }
 0x296   :  { %v5083_v39 = vadd.f32 %v5151_v25, %v5076_v42 }
 0x298   :  { %v5088_v41 = vsel %vm5084_vm0, %v5083_v39, 0.0 }
 0x299   :  { %5089 = vadd.xlane.f32.xlu1 %v5088_v41 }
 0x322   :  { %v5087_v56 = vpop.xlane.xlu0 %5086 }
 0x323   :  { %v5092_v32 = vmul.f32 0.03125, %v5087_v56 }
 0x325   :  { %v5094_v47 = vsub.f32 %v5082_v15, %v5092_v32 }
 0x326   :  { %v5090_v5 = vpop.xlane.xlu1 %5089 }
 0x327   :  { %v5093_v48 = vmul.f32 0.03125, %v5090_v5  ;;  %v5096_v19 = vmul.f32 %v5094_v47, %v5094_v47 }
 0x329   :  { %v5095_v55 = vsub.f32 %v5083_v39, %v5093_v48  ;;  %v5098_v34 = vsel %vm5084_vm0, %v5096_v19, 0.0 }
 0x32a   :  { %5099 = vadd.xlane.f32.xlu0 %v5098_v34 }
 0x32b   :  { %v5097_v60 = vmul.f32 %v5095_v55, %v5095_v55 }
 0x32d   :  { %v5101_v21 = vsel %vm5084_vm0, %v5097_v60, 0.0 }
 0x32e   :  { %5102 = vadd.xlane.f32.xlu0 %v5101_v21 }
 0x3b7   :  { %v5100_v23 = vpop.xlane.xlu0 %5099 }
 0x3b8   :  { %v5104_v10 = vmul.f32 0.03125, %v5100_v23 }
 0x3ba   :  { %v5106_v2 = vadd.f32 1e-12, %v5104_v10 }
 0x3bb   :  { %v5103_v16 = vpop.xlane.xlu0 %5102 }
 0x3bc   :  { %5557 = vrsqrt.f32 %v5106_v2  ;;  %v5105_v30 = vmul.f32 0.03125, %v5103_v16 }
 0x3be   :  { %v5107_v20 = vadd.f32 1e-12, %v5105_v30 }
 0x3c0   :  { %5559 = vrsqrt.f32 %v5107_v20 }
 0x3c6   :  { %v5558_v7 = vpop.eup %5557 }
 0x3c7   :  { %v5110_v17 = vmul.f32 %v5558_v7, %v5094_v47 }
 0x3c9   :  { %v5117_v59 = vmul.f32 %v5152_v6, %v5110_v17 }
 0x3ca   :  { %v5560_v52 = vpop.eup %5559 }
 0x3cb   :  { %v5111_v13 = vmul.f32 %v5560_v52, %v5095_v55  ;;  %v5124_v8 = vadd.f32 %v5153_v27, %v5117_v59 }
 0x3cd   :  { %v5118_v26 = vmul.f32 %v5152_v6, %v5111_v13  ;;  %5126 = vst.msk [vmem:[#allocation7] sm:$0xff] %vm5084_vm0, %v5124_v8 }
 0x3cf   :  { %v5125_v61 = vadd.f32 %v5153_v27, %v5118_v26 }
 0x3d1   :  { %5127 = vst.msk [vmem:[#allocation7 + $0x8] sm:$0xff] %vm5084_vm0, %v5125_v61 }
 0x3d2   :  { %5618 = shalt.err (!%p5615_p6)
}
 0x3d3   :  { %s5619_s2 = scalar_lea.hbm %s7053_s4, 256 }
 0x3d4   :  { %p5620_p7 = scmp.ne.s32.totalorder %s7053_s4, %s5619_s2  ;;  %p5623_p8 = scmp.lt.u32.totalorder %s5619_s2, %s7053_s4 }
 0x3d6   :  { %p5625_p9 = pnand %p5623_p8, %p5620_p7 }
 0x3d8   :  { %5628 = shalt.err (!%p5625_p9)
}
 0x3d9   :  { %s5645_s18 = smov 8  }
 0x3da   :  { %5139 = dma.vmem_to_hbm [thread:$0]  %s5134_s12, 256, %s7053_s4, [#allocation4], %s5637_s26, %s5637_s26, %s5645_s18  }
 0x3db   :  { %5633 = dma.done.wait [#allocation4], 256  }
 0x3dc   :  { %5634 = vsyncadd [#allocation4], 4294967040 }
 0x3dd   :  { %5143 = vsyncpa [#allocation3], 1 }
 0x3de   :  { %5144 = vsyncpa [#allocation6], 1 }
 0x3df   :  { %5145 = vsyncpa [#allocation4], 1 }

</bundles_post_ra>
